<compile_context>
chip_gen: v7x
topology: tpu7x:2x2x1
jax: 0.10.0
libtpu: 0.0.40
codegen_flags: <defaults>
</compile_context>

<pallas_src>
import numpy as np

import jax
import jax.numpy as jnp
from jax import lax
from jax.experimental import pallas as pl
from jax.experimental.pallas import tpu as pltpu

EPS = 1e-3  # torchvision EfficientNet BatchNorm eps


# ---------------------------- fused Pallas kernel ----------------------------

def _effnet_fused_kernel(
    xw_ref,              # (Nb, Ho+1, 2*(W+2)*Cin)   H-phase-split padded input rows
    wbig_ref,            # (2, 2*(W+2)*Cin, Wo*C1)   stem conv as banded matrices (BN folded)
    b0w_ref,             # (1, Wo*C1)                stem bias, lane-tiled
    dmat_ref,            # (3, Wo*C1, Wo*C1)         depthwise kernel rows as banded matrices
    b1w_ref,             # (1, Wo*C1)                depthwise bias, lane-tiled
    w1_ref, bse1_ref,    # (Cr, C1), (1, Cr)         SE reduce fc
    w2t_ref, bse2_ref,   # (Cr, C1), (1, C1)         SE expand fc (transposed)
    pmat_ref,            # (Wo*C1, Wo*C2)            1x1 projection, block-diag (BN folded)
    b2w_ref,             # (1, Wo*C2)                projection bias, lane-tiled
    out1_ref,            # (Nb, Ho, Wo*C1)           feature map after B0 (lane-dense)
    out2_ref,            # (Nb, Ho, Wo*C2)           feature map after B1 (lane-dense)
):
    Nb, Ho, WC1 = out1_ref.shape
    WC2 = out2_ref.shape[2]
    Kw = xw_ref.shape[2]
    Cr, C1 = w1_ref.shape
    Wo = WC1 // C1
    f32 = jnp.float32

    # ----- B0: stem 3x3/s2 conv + BN + SiLU, as two MXU matmuls (one per H offset) -----
    acc = jnp.zeros((Nb * Ho, WC1), f32)
    for a in range(2):
        lhs = xw_ref[:, a:a + Ho, :].reshape(Nb * Ho, Kw)      # leading-dim merge only
        acc = acc + jnp.dot(lhs, wbig_ref[a], preferred_element_type=f32)
    y = acc + b0w_ref[...]
    feat1 = y * jax.nn.sigmoid(y)                              # SiLU, (Nb*Ho, Wo*C1)
    out1_ref[...] = feat1.reshape(Nb, Ho, WC1)                 # unmasked lane-dense store

    # ----- B1: depthwise 3x3/s1/p1 + BN + SiLU: 3 banded matmuls + 2 zero-row concats -----
    r = [jnp.dot(feat1, dmat_ref[dy], preferred_element_type=f32).reshape(Nb, Ho, WC1)
         for dy in range(3)]
    zrow = jnp.zeros((Nb, 1, WC1), f32)
    acc2 = r[1]
    acc2 = acc2 + jnp.concatenate([zrow, r[0][:, :Ho - 1, :]], axis=1)   # from row i-1
    acc2 = acc2 + jnp.concatenate([r[2][:, 1:, :], zrow], axis=1)        # from row i+1
    y = acc2 + b1w_ref[...]
    z = y * jax.nn.sigmoid(y)                                  # (Nb, Ho, Wo*C1)

    # ----- squeeze-excitation (global mean pool -> 2 tiny FCs -> sigmoid gate) -----
    srow = jnp.sum(z, axis=1)                                  # (Nb, Wo*C1)
    pooled = jnp.zeros((Nb, C1), f32)
    for j in range(Wo):                                        # lane-group reduce over W
        pooled = pooled + srow[:, j * C1:(j + 1) * C1]
    pooled = pooled * (1.0 / (Ho * Wo))
    h = jnp.sum(pooled[:, None, :] * w1_ref[...][None, :, :], axis=-1) + bse1_ref[...]
    h = h * jax.nn.sigmoid(h)                                  # SiLU, (Nb, Cr)
    se = jax.nn.sigmoid(
        jnp.sum(h[:, :, None] * w2t_ref[...][None, :, :], axis=1) + bse2_ref[...])  # (Nb, C1)
    se_w = jnp.concatenate([se] * Wo, axis=-1)                 # (Nb, Wo*C1) lane-tiled gate

    # ----- SE gate + 1x1 projection + BN (scale folded into pmat): one MXU matmul -----
    zs = (z * se_w[:, None, :]).reshape(Nb * Ho, WC1)
    y2 = jnp.dot(zs, pmat_ref[...], preferred_element_type=f32) + b2w_ref[...]
    out2_ref[...] = y2.reshape(Nb, Ho, WC2)                    # unmasked lane-dense store


# ---------------------------- host-side parameter prep ----------------------------

def _fold_bn_np(g, b, m, v):
    g, b, m, v = (np.asarray(a, np.float32) for a in (g, b, m, v))
    s = g / np.sqrt(v + EPS)
    return s, b - m * s


def prepare_params(p, H, W):
    """One-time host prep: fold BN, build banded / block-diag matrices for the kernel."""
    Ho, Wo = H // 2, W // 2
    C1, Cin = p['stem_w'].shape[0], p['stem_w'].shape[1]
    C2 = p['proj_w'].shape[0]
    Cr = p['se_w1'].shape[0]

    s0, b0 = _fold_bn_np(p['stem_bn_g'], p['stem_bn_b'], p['stem_bn_m'], p['stem_bn_v'])
    s1, b1 = _fold_bn_np(p['dw_bn_g'], p['dw_bn_b'], p['dw_bn_m'], p['dw_bn_v'])
    s2, b2 = _fold_bn_np(p['proj_bn_g'], p['proj_bn_b'], p['proj_bn_m'], p['proj_bn_v'])

    # Stem conv (BN scale folded) as two banded (2*(W+2)*Cin, Wo*C1) matrices, one per
    # H-phase-slab offset a; lane index of the input slab = ph*(W+2)*Cin + w_pad*Cin + c.
    wst = np.asarray(p['stem_w'], np.float32) * s0[:, None, None, None]     # OIHW
    Kw = 2 * (W + 2) * Cin
    wbig = np.zeros((2, Kw, Wo * C1), np.float32)
    for a in range(2):
        for ph in range(2):
            dy = 2 * a + ph
            if dy > 2:
                continue
            for dx in range(3):
                for j in range(Wo):
                    wp = 2 * j + dx                                          # padded col
                    r0 = ph * (W + 2) * Cin + wp * Cin
                    wbig[a, r0:r0 + Cin, j * C1:(j + 1) * C1] = wst[:, :, dy, dx].T

    # Depthwise conv (BN scale folded): each kernel row dy becomes a banded diagonal
    # (Wo*C1, Wo*C1) matrix (encodes the W shift and W zero-padding per channel).
    wdw = np.asarray(p['dw_w'], np.float32)[:, 0] * s1[:, None, None]        # (C1, 3, 3)
    dmat = np.zeros((3, Wo * C1, Wo * C1), np.float32)
    ar = np.arange(C1)
    for dy in range(3):
        for dx in range(3):
            for j in range(Wo):
                jp = j + dx - 1
                if 0 <= jp < Wo:
                    dmat[dy, jp * C1 + ar, j * C1 + ar] = wdw[:, dy, dx]

    # 1x1 projection (BN scale folded), block-diagonal so input and output stay in the
    # lane-dense (W*C) layout.
    wpr = np.asarray(p['proj_w'], np.float32)[:, :, 0, 0].T * s2[None, :]    # (C1, C2)
    pmat = np.zeros((Wo * C1, Wo * C2), np.float32)
    for j in range(Wo):
        pmat[j * C1:(j + 1) * C1, j * C2:(j + 1) * C2] = wpr

    prep = dict(
        wbig=wbig,
        b0w=np.tile(b0, Wo).reshape(1, Wo * C1),
        dmat=dmat,
        b1w=np.tile(b1, Wo).reshape(1, Wo * C1),
        w1=np.asarray(p['se_w1'], np.float32)[:, :, 0, 0],
        bse1=np.asarray(p['se_b1'], np.float32).reshape(1, Cr),
        w2t=np.asarray(p['se_w2'], np.float32)[:, :, 0, 0].T,
        bse2=np.asarray(p['se_b2'], np.float32).reshape(1, C1),
        pmat=pmat,
        b2w=np.tile(b2, Wo).reshape(1, Wo * C2),
    )
    return {k: jnp.asarray(v, jnp.float32) for k, v in prep.items()}


def _pick_batch_block(n, cap=8):
    """Largest divisor of n <= cap, keeping >= 2 grid steps when possible (megacore)."""
    best = 1
    for c in range(1, min(n, cap) + 1):
        if n % c == 0 and (n // c >= 2 or n == 1):
            best = c
    return best


# ---------------------------- forward (Pallas) ----------------------------

def effnet_forward_pallas(imgs_nchw, prep):
    N, Cin, H, W = imgs_nchw.shape
    Ho, Wo = H // 2, W // 2
    WC1 = prep['b0w'].shape[1]
    WC2 = prep['b2w'].shape[1]
    C1, C2 = WC1 // Wo, WC2 // Wo
    Kw = 2 * (W + 2) * Cin

    # NHWC + spatial pad 1, then split the H stride-2 grid into its two phases and
    # flatten each padded row to lanes so the kernel only ever does unit-stride row
    # slices feeding the MXU.  (At real resolution this prep would move in-kernel.)
    x = jnp.transpose(imgs_nchw, (0, 2, 3, 1))
    xp = jnp.pad(x, ((0, 0), (1, 1), (1, 1), (0, 0)))
    xw = jnp.concatenate(
        [xp[:, 0::2].reshape(N, Ho + 1, (W + 2) * Cin),
         xp[:, 1::2].reshape(N, Ho + 1, (W + 2) * Cin)], axis=-1)       # (N, Ho+1, Kw)

    Nb = _pick_batch_block(N)      # batch block per grid step (re-derive cap for v7x VMEM)
    grid = (N // Nb,)

    def bcast(shape):
        nd = len(shape)
        return pl.BlockSpec(shape, lambda n, _nd=nd: (0,) * _nd)

    out1, out2 = pl.pallas_call(
        _effnet_fused_kernel,
        grid=grid,
        in_specs=[
            pl.BlockSpec((Nb, Ho + 1, Kw), lambda n: (n, 0, 0)),
            bcast(prep['wbig'].shape),
            bcast(prep['b0w'].shape),
            bcast(prep['dmat'].shape),
            bcast(prep['b1w'].shape),
            bcast(prep['w1'].shape),
            bcast(prep['bse1'].shape),
            bcast(prep['w2t'].shape),
            bcast(prep['bse2'].shape),
            bcast(prep['pmat'].shape),
            bcast(prep['b2w'].shape),
        ],
        out_specs=(
            pl.BlockSpec((Nb, Ho, WC1), lambda n: (n, 0, 0)),
            pl.BlockSpec((Nb, Ho, WC2), lambda n: (n, 0, 0)),
        ),
        out_shape=(
            jax.ShapeDtypeStruct((N, Ho, WC1), jnp.float32),    # lane-dense: 256 lanes
            jax.ShapeDtypeStruct((N, Ho, WC2), jnp.float32),    # lane-dense: 128 lanes
        ),
        compiler_params=pltpu.CompilerParams(
            dimension_semantics=("parallel",)),
    )(xw, prep['wbig'], prep['b0w'], prep['dmat'], prep['b1w'],
      prep['w1'], prep['bse1'], prep['w2t'], prep['bse2'],
      prep['pmat'], prep['b2w'])

    # PyTorch-facing NCHW (cheap wrapper-side reshuffle; kernel stays lane-dense)
    f1 = out1.reshape(N, Ho, Wo, C1).transpose(0, 3, 1, 2)
    f2 = out2.reshape(N, Ho, Wo, C2).transpose(0, 3, 1, 2)
    return [f1, f2]


# ---------------------------- reference (pure JAX) ----------------------------

def effnet_forward_ref(imgs, p):
    def bn(x, g, b, m, v):
        s = g / jnp.sqrt(v + EPS)
        return x * s[None, :, None, None] + (b - m * s)[None, :, None, None]

    def silu(x):
        return x * jax.nn.sigmoid(x)

    dn = ('NCHW', 'OIHW', 'NCHW')
    y = lax.conv_general_dilated(imgs, p['stem_w'], (2, 2), ((1, 1), (1, 1)),
                                 dimension_numbers=dn)
    f1 = silu(bn(y, p['stem_bn_g'], p['stem_bn_b'], p['stem_bn_m'], p['stem_bn_v']))
    z = lax.conv_general_dilated(f1, p['dw_w'], (1, 1), ((1, 1), (1, 1)),
                                 dimension_numbers=dn, feature_group_count=32)
    z = silu(bn(z, p['dw_bn_g'], p['dw_bn_b'], p['dw_bn_m'], p['dw_bn_v']))
    pooled = jnp.mean(z, axis=(2, 3))
    h = silu(pooled @ p['se_w1'][:, :, 0, 0].T + p['se_b1'])
    s = jax.nn.sigmoid(h @ p['se_w2'][:, :, 0, 0].T + p['se_b2'])
    zs = z * s[:, :, None, None]
    y2 = lax.conv_general_dilated(zs, p['proj_w'], (1, 1), ((0, 0), (0, 0)),
                                  dimension_numbers=dn)
    f2 = bn(y2, p['proj_bn_g'], p['proj_bn_b'], p['proj_bn_m'], p['proj_bn_v'])
    return [f1, f2]


# ---------------------------- parameters ----------------------------

def init_params(key):
    ks = jax.random.split(key, 20)

    def n(k, shape, scale=0.1):
        return scale * jax.random.normal(k, shape, jnp.float32)

    p = {}
    # stem: Conv2d(3, 32, 3, stride=2, padding=1, bias=False) + BN(32)
    p['stem_w'] = n(ks[0], (32, 3, 3, 3), 0.3)
    p['stem_bn_g'] = 1.0 + n(ks[1], (32,))
    p['stem_bn_b'] = n(ks[2], (32,))
    p['stem_bn_m'] = n(ks[3], (32,))
    p['stem_bn_v'] = 0.9 + 0.1 * jax.random.uniform(ks[4], (32,), jnp.float32)
    # MBConv1 depthwise: Conv2d(32, 32, 3, padding=1, groups=32, bias=False) + BN(32)
    p['dw_w'] = n(ks[5], (32, 1, 3, 3), 0.3)
    p['dw_bn_g'] = 1.0 + n(ks[6], (32,))
    p['dw_bn_b'] = n(ks[7], (32,))
    p['dw_bn_m'] = n(ks[8], (32,))
    p['dw_bn_v'] = 0.9 + 0.1 * jax.random.uniform(ks[9], (32,), jnp.float32)
    # SqueezeExcitation: Conv2d(32, 8, 1), Conv2d(8, 32, 1) with biases
    p['se_w1'] = n(ks[10], (8, 32, 1, 1), 0.3)
    p['se_b1'] = n(ks[11], (8,))
    p['se_w2'] = n(ks[12], (32, 8, 1, 1), 0.3)
    p['se_b2'] = n(ks[13], (32,))
    # projection: Conv2d(32, 16, 1, bias=False) + BN(16)
    p['proj_w'] = n(ks[14], (16, 32, 1, 1), 0.3)
    p['proj_bn_g'] = 1.0 + n(ks[15], (16,))
    p['proj_bn_b'] = n(ks[16], (16,))
    p['proj_bn_m'] = n(ks[17], (16,))
    p['proj_bn_v'] = 0.9 + 0.1 * jax.random.uniform(ks[18], (16,), jnp.float32)
    return p


# ---------------------------- main ----------------------------

if __name__ == "__main__":
    key = jax.random.PRNGKey(0)
    pkey, xkey = jax.random.split(key)
    params = init_params(pkey)
    imgs = jax.random.normal(xkey, (2, 3, 16, 16), jnp.float32)  # NCHW, like PyTorch

    prep = prepare_params(params, 16, 16)                        # one-time host prep
    fwd = jax.jit(lambda x: effnet_forward_pallas(x, prep))

    feats = fwd(imgs)
    feats = [jax.block_until_ready(f) for f in feats]

    refs = effnet_forward_ref(imgs, params)
    assert feats[0].shape == (2, 32, 8, 8) and feats[1].shape == (2, 16, 8, 8)
    for f, r in zip(feats, refs):
        assert f.shape == r.shape
        err = float(jnp.max(jnp.abs(f - r)))
        assert err < 1e-3, f"mismatch: {err}"

    print("KERNEL_OK")
</pallas_src>

<mosaic_0001>
module attributes {stable_mosaic.version = 11 : i64} {
  func.func @_effnet_fused_kernel(%arg0: i32, %arg1: memref<1x9x108xf32, #tpu.memory_space<vmem>>, %arg2: memref<2x108x256xf32, #tpu.memory_space<vmem>>, %arg3: memref<1x256xf32, #tpu.memory_space<vmem>>, %arg4: memref<3x256x256xf32, #tpu.memory_space<vmem>>, %arg5: memref<1x256xf32, #tpu.memory_space<vmem>>, %arg6: memref<8x32xf32, #tpu.memory_space<vmem>>, %arg7: memref<1x8xf32, #tpu.memory_space<vmem>>, %arg8: memref<8x32xf32, #tpu.memory_space<vmem>>, %arg9: memref<1x32xf32, #tpu.memory_space<vmem>>, %arg10: memref<256x128xf32, #tpu.memory_space<vmem>>, %arg11: memref<1x128xf32, #tpu.memory_space<vmem>>, %arg12: memref<1x8x256xf32, #tpu.memory_space<vmem>>, %arg13: memref<1x8x128xf32, #tpu.memory_space<vmem>>) attributes {dimension_semantics = [#tpu.dimension_semantics<parallel>], iteration_bounds = array<i64: 2>, scalar_prefetch = 0 : i64, scratch_operands = 0 : i64, tpu.core_type = #tpu.core_type<tc>, window_params = [{transform_indices = @transform_0, window_bounds = array<i64: 1, 9, 108>}, {pipeline_mode = #tpu.pipeline_mode<synchronous>, transform_indices = @transform_1, window_bounds = array<i64: 2, 108, 256>}, {pipeline_mode = #tpu.pipeline_mode<synchronous>, transform_indices = @transform_2, window_bounds = array<i64: 1, 256>}, {pipeline_mode = #tpu.pipeline_mode<synchronous>, transform_indices = @transform_3, window_bounds = array<i64: 3, 256, 256>}, {pipeline_mode = #tpu.pipeline_mode<synchronous>, transform_indices = @transform_4, window_bounds = array<i64: 1, 256>}, {pipeline_mode = #tpu.pipeline_mode<synchronous>, transform_indices = @transform_5, window_bounds = array<i64: 8, 32>}, {pipeline_mode = #tpu.pipeline_mode<synchronous>, transform_indices = @transform_6, window_bounds = array<i64: 1, 8>}, {pipeline_mode = #tpu.pipeline_mode<synchronous>, transform_indices = @transform_7, window_bounds = array<i64: 8, 32>}, {pipeline_mode = #tpu.pipeline_mode<synchronous>, transform_indices = @transform_8, window_bounds = array<i64: 1, 32>}, {pipeline_mode = #tpu.pipeline_mode<synchronous>, transform_indices = @transform_9, window_bounds = array<i64: 256, 128>}, {pipeline_mode = #tpu.pipeline_mode<synchronous>, transform_indices = @transform_10, window_bounds = array<i64: 1, 128>}, {transform_indices = @transform_11, window_bounds = array<i64: 1, 8, 256>}, {transform_indices = @transform_12, window_bounds = array<i64: 1, 8, 128>}]} {
    %cst = arith.constant 0.000000e+00 : f32
    %0 = vector.broadcast %cst : f32 to vector<8x256xf32>
    %c0 = arith.constant 0 : index
    %c0_0 = arith.constant 0 : index
    %c0_1 = arith.constant 0 : index
    %1 = vector.load %arg1[%c0, %c0_0, %c0_1] : memref<1x9x108xf32, #tpu.memory_space<vmem>>, vector<1x8x108xf32>
    %2 = vector.shape_cast %1 : vector<1x8x108xf32> to vector<8x108xf32>
    %c0_2 = arith.constant 0 : index
    %c0_3 = arith.constant 0 : index
    %c0_4 = arith.constant 0 : index
    %3 = vector.load %arg2[%c0_2, %c0_3, %c0_4] : memref<2x108x256xf32, #tpu.memory_space<vmem>>, vector<1x108x256xf32>
    %4 = vector.shape_cast %3 : vector<1x108x256xf32> to vector<108x256xf32>
    %cst_5 = arith.constant dense<0.000000e+00> : vector<8x256xf32>
    %5 = tpu.matmul %2, %4, %cst_5 {dimension_numbers = #tpu.dot_dimension_numbers<[1], [0], [0], [1], [0, 0, 1, 1], [], []>} : vector<8x108xf32>, vector<108x256xf32>, vector<8x256xf32> -> vector<8x256xf32>
    %6 = arith.addf %0, %5 : vector<8x256xf32>
    %c0_6 = arith.constant 0 : index
    %c1 = arith.constant 1 : index
    %c0_7 = arith.constant 0 : index
    %7 = vector.load %arg1[%c0_6, %c1, %c0_7] : memref<1x9x108xf32, #tpu.memory_space<vmem>>, vector<1x8x108xf32>
    %8 = vector.shape_cast %7 : vector<1x8x108xf32> to vector<8x108xf32>
    %c1_8 = arith.constant 1 : index
    %c0_9 = arith.constant 0 : index
    %c0_10 = arith.constant 0 : index
    %9 = vector.load %arg2[%c1_8, %c0_9, %c0_10] : memref<2x108x256xf32, #tpu.memory_space<vmem>>, vector<1x108x256xf32>
    %10 = vector.shape_cast %9 : vector<1x108x256xf32> to vector<108x256xf32>
    %cst_11 = arith.constant dense<0.000000e+00> : vector<8x256xf32>
    %11 = tpu.matmul %8, %10, %cst_11 {dimension_numbers = #tpu.dot_dimension_numbers<[1], [0], [0], [1], [0, 0, 1, 1], [], []>} : vector<8x108xf32>, vector<108x256xf32>, vector<8x256xf32> -> vector<8x256xf32>
    %12 = arith.addf %6, %11 : vector<8x256xf32>
    %c0_12 = arith.constant 0 : index
    %c0_13 = arith.constant 0 : index
    %13 = vector.load %arg3[%c0_12, %c0_13] : memref<1x256xf32, #tpu.memory_space<vmem>>, vector<1x256xf32>
    %14 = vector.broadcast %13 : vector<1x256xf32> to vector<8x256xf32>
    %15 = arith.addf %12, %14 : vector<8x256xf32>
    %16 = arith.negf %15 : vector<8x256xf32>
    %17 = math.exp %16 : vector<8x256xf32>
    %cst_14 = arith.constant 1.000000e+00 : f32
    %18 = vector.broadcast %cst_14 : f32 to vector<8x256xf32>
    %19 = arith.addf %18, %17 : vector<8x256xf32>
    %20 = arith.divf %18, %19 : vector<8x256xf32>
    %21 = arith.mulf %15, %20 : vector<8x256xf32>
    %22 = vector.shape_cast %21 : vector<8x256xf32> to vector<1x8x256xf32>
    %c0_15 = arith.constant 0 : index
    %c0_16 = arith.constant 0 : index
    %c0_17 = arith.constant 0 : index
    %23 = vector.load %arg12[%c0_15, %c0_16, %c0_17] : memref<1x8x256xf32, #tpu.memory_space<vmem>>, vector<1x8x256xf32>
    tpu.vector_store %arg12[%c0_15, %c0_16, %c0_17], %22 {strides = array<i32>} : memref<1x8x256xf32, #tpu.memory_space<vmem>>, vector<1x8x256xf32>,
    %c0_18 = arith.constant 0 : index
    %c0_19 = arith.constant 0 : index
    %c0_20 = arith.constant 0 : index
    %24 = vector.load %arg4[%c0_18, %c0_19, %c0_20] : memref<3x256x256xf32, #tpu.memory_space<vmem>>, vector<1x256x256xf32>
    %25 = vector.shape_cast %24 : vector<1x256x256xf32> to vector<256x256xf32>
    %cst_21 = arith.constant dense<0.000000e+00> : vector<8x256xf32>
    %26 = tpu.matmul %21, %25, %cst_21 {dimension_numbers = #tpu.dot_dimension_numbers<[1], [0], [0], [1], [0, 0, 1, 1], [], []>} : vector<8x256xf32>, vector<256x256xf32>, vector<8x256xf32> -> vector<8x256xf32>
    %27 = vector.shape_cast %26 : vector<8x256xf32> to vector<1x8x256xf32>
    %c1_22 = arith.constant 1 : index
    %c0_23 = arith.constant 0 : index
    %c0_24 = arith.constant 0 : index
    %28 = vector.load %arg4[%c1_22, %c0_23, %c0_24] : memref<3x256x256xf32, #tpu.memory_space<vmem>>, vector<1x256x256xf32>
    %29 = vector.shape_cast %28 : vector<1x256x256xf32> to vector<256x256xf32>
    %cst_25 = arith.constant dense<0.000000e+00> : vector<8x256xf32>
    %30 = tpu.matmul %21, %29, %cst_25 {dimension_numbers = #tpu.dot_dimension_numbers<[1], [0], [0], [1], [0, 0, 1, 1], [], []>} : vector<8x256xf32>, vector<256x256xf32>, vector<8x256xf32> -> vector<8x256xf32>
    %31 = vector.shape_cast %30 : vector<8x256xf32> to vector<1x8x256xf32>
    %c2 = arith.constant 2 : index
    %c0_26 = arith.constant 0 : index
    %c0_27 = arith.constant 0 : index
    %32 = vector.load %arg4[%c2, %c0_26, %c0_27] : memref<3x256x256xf32, #tpu.memory_space<vmem>>, vector<1x256x256xf32>
    %33 = vector.shape_cast %32 : vector<1x256x256xf32> to vector<256x256xf32>
    %cst_28 = arith.constant dense<0.000000e+00> : vector<8x256xf32>
    %34 = tpu.matmul %21, %33, %cst_28 {dimension_numbers = #tpu.dot_dimension_numbers<[1], [0], [0], [1], [0, 0, 1, 1], [], []>} : vector<8x256xf32>, vector<256x256xf32>, vector<8x256xf32> -> vector<8x256xf32>
    %35 = vector.shape_cast %34 : vector<8x256xf32> to vector<1x8x256xf32>
    %cst_29 = arith.constant 0.000000e+00 : f32
    %36 = vector.broadcast %cst_29 : f32 to vector<1x1x256xf32>
    %37 = vector.extract_strided_slice %27 {offsets = [0, 0, 0], sizes = [1, 7, 256], strides = [1, 1, 1]} : vector<1x8x256xf32> to vector<1x7x256xf32>
    %38 = tpu.concatenate %36, %37 in 1 : vector<1x1x256xf32>, vector<1x7x256xf32> -> vector<1x8x256xf32>
    %39 = arith.addf %31, %38 : vector<1x8x256xf32>
    %40 = vector.extract_strided_slice %35 {offsets = [0, 1, 0], sizes = [1, 7, 256], strides = [1, 1, 1]} : vector<1x8x256xf32> to vector<1x7x256xf32>
    %41 = tpu.concatenate %40, %36 in 1 : vector<1x7x256xf32>, vector<1x1x256xf32> -> vector<1x8x256xf32>
    %42 = arith.addf %39, %41 : vector<1x8x256xf32>
    %c0_30 = arith.constant 0 : index
    %c0_31 = arith.constant 0 : index
    %43 = vector.load %arg5[%c0_30, %c0_31] : memref<1x256xf32, #tpu.memory_space<vmem>>, vector<1x256xf32>
    %44 = vector.shape_cast %43 : vector<1x256xf32> to vector<1x1x256xf32>
    %45 = vector.broadcast %44 : vector<1x1x256xf32> to vector<1x8x256xf32>
    %46 = arith.addf %42, %45 : vector<1x8x256xf32>
    %47 = arith.negf %46 : vector<1x8x256xf32>
    %48 = math.exp %47 : vector<1x8x256xf32>
    %cst_32 = arith.constant 1.000000e+00 : f32
    %49 = vector.broadcast %cst_32 : f32 to vector<1x8x256xf32>
    %50 = arith.addf %49, %48 : vector<1x8x256xf32>
    %51 = arith.divf %49, %50 : vector<1x8x256xf32>
    %52 = arith.mulf %46, %51 : vector<1x8x256xf32>
    %cst_33 = arith.constant dense<0.000000e+00> : vector<1x256xf32>
    %53 = vector.multi_reduction <add>, %52, %cst_33 [1] : vector<1x8x256xf32> to vector<1x256xf32>
    %cst_34 = arith.constant 0.000000e+00 : f32
    %54 = vector.broadcast %cst_34 : f32 to vector<1x32xf32>
    %55 = vector.extract_strided_slice %53 {offsets = [0, 0], sizes = [1, 32], strides = [1, 1]} : vector<1x256xf32> to vector<1x32xf32>
    %56 = arith.addf %54, %55 : vector<1x32xf32>
    %57 = vector.extract_strided_slice %53 {offsets = [0, 32], sizes = [1, 32], strides = [1, 1]} : vector<1x256xf32> to vector<1x32xf32>
    %58 = arith.addf %56, %57 : vector<1x32xf32>
    %59 = vector.extract_strided_slice %53 {offsets = [0, 64], sizes = [1, 32], strides = [1, 1]} : vector<1x256xf32> to vector<1x32xf32>
    %60 = arith.addf %58, %59 : vector<1x32xf32>
    %61 = vector.extract_strided_slice %53 {offsets = [0, 96], sizes = [1, 32], strides = [1, 1]} : vector<1x256xf32> to vector<1x32xf32>
    %62 = arith.addf %60, %61 : vector<1x32xf32>
    %63 = vector.extract_strided_slice %53 {offsets = [0, 128], sizes = [1, 32], strides = [1, 1]} : vector<1x256xf32> to vector<1x32xf32>
    %64 = arith.addf %62, %63 : vector<1x32xf32>
    %65 = vector.extract_strided_slice %53 {offsets = [0, 160], sizes = [1, 32], strides = [1, 1]} : vector<1x256xf32> to vector<1x32xf32>
    %66 = arith.addf %64, %65 : vector<1x32xf32>
    %67 = vector.extract_strided_slice %53 {offsets = [0, 192], sizes = [1, 32], strides = [1, 1]} : vector<1x256xf32> to vector<1x32xf32>
    %68 = arith.addf %66, %67 : vector<1x32xf32>
    %69 = vector.extract_strided_slice %53 {offsets = [0, 224], sizes = [1, 32], strides = [1, 1]} : vector<1x256xf32> to vector<1x32xf32>
    %70 = arith.addf %68, %69 : vector<1x32xf32>
    %cst_35 = arith.constant 1.562500e-02 : f32
    %71 = vector.broadcast %cst_35 : f32 to vector<1x32xf32>
    %72 = arith.mulf %70, %71 : vector<1x32xf32>
    %73 = vector.shape_cast %72 : vector<1x32xf32> to vector<1x1x32xf32>
    %c0_36 = arith.constant 0 : index
    %c0_37 = arith.constant 0 : index
    %74 = vector.load %arg6[%c0_36, %c0_37] : memref<8x32xf32, #tpu.memory_space<vmem>>, vector<8x32xf32>
    %75 = vector.shape_cast %74 : vector<8x32xf32> to vector<1x8x32xf32>
    %76 = vector.broadcast %73 : vector<1x1x32xf32> to vector<1x8x32xf32>
    %77 = arith.mulf %76, %75 : vector<1x8x32xf32>
    %cst_38 = arith.constant dense<0.000000e+00> : vector<1x8xf32>
    %78 = vector.multi_reduction <add>, %77, %cst_38 [2] : vector<1x8x32xf32> to vector<1x8xf32>
    %c0_39 = arith.constant 0 : index
    %c0_40 = arith.constant 0 : index
    %79 = vector.load %arg7[%c0_39, %c0_40] : memref<1x8xf32, #tpu.memory_space<vmem>>, vector<1x8xf32>
    %80 = arith.addf %78, %79 : vector<1x8xf32>
    %81 = arith.negf %80 : vector<1x8xf32>
    %82 = math.exp %81 : vector<1x8xf32>
    %cst_41 = arith.constant 1.000000e+00 : f32
    %83 = vector.broadcast %cst_41 : f32 to vector<1x8xf32>
    %84 = arith.addf %83, %82 : vector<1x8xf32>
    %85 = arith.divf %83, %84 : vector<1x8xf32>
    %86 = arith.mulf %80, %85 : vector<1x8xf32>
    %87 = vector.shape_cast %86 : vector<1x8xf32> to vector<1x8x1xf32>
    %c0_42 = arith.constant 0 : index
    %c0_43 = arith.constant 0 : index
    %88 = vector.load %arg8[%c0_42, %c0_43] : memref<8x32xf32, #tpu.memory_space<vmem>>, vector<8x32xf32>
    %89 = vector.shape_cast %88 : vector<8x32xf32> to vector<1x8x32xf32>
    %90 = vector.broadcast %87 : vector<1x8x1xf32> to vector<1x8x32xf32>
    %91 = arith.mulf %90, %89 : vector<1x8x32xf32>
    %cst_44 = arith.constant dense<0.000000e+00> : vector<1x32xf32>
    %92 = vector.multi_reduction <add>, %91, %cst_44 [1] : vector<1x8x32xf32> to vector<1x32xf32>
    %c0_45 = arith.constant 0 : index
    %c0_46 = arith.constant 0 : index
    %93 = vector.load %arg9[%c0_45, %c0_46] : memref<1x32xf32, #tpu.memory_space<vmem>>, vector<1x32xf32>
    %94 = arith.addf %92, %93 : vector<1x32xf32>
    %95 = arith.negf %94 : vector<1x32xf32>
    %96 = math.exp %95 : vector<1x32xf32>
    %cst_47 = arith.constant 1.000000e+00 : f32
    %97 = vector.broadcast %cst_47 : f32 to vector<1x32xf32>
    %98 = arith.addf %97, %96 : vector<1x32xf32>
    %99 = arith.divf %97, %98 : vector<1x32xf32>
    %100 = tpu.concatenate %99, %99, %99, %99, %99, %99, %99, %99 in 1 : vector<1x32xf32>, vector<1x32xf32>, vector<1x32xf32>, vector<1x32xf32>, vector<1x32xf32>, vector<1x32xf32>, vector<1x32xf32>, vector<1x32xf32> -> vector<1x256xf32>
    %101 = vector.shape_cast %100 : vector<1x256xf32> to vector<1x1x256xf32>
    %102 = vector.broadcast %101 : vector<1x1x256xf32> to vector<1x8x256xf32>
    %103 = arith.mulf %52, %102 : vector<1x8x256xf32>
    %104 = vector.shape_cast %103 : vector<1x8x256xf32> to vector<8x256xf32>
    %c0_48 = arith.constant 0 : index
    %c0_49 = arith.constant 0 : index
    %105 = vector.load %arg10[%c0_48, %c0_49] : memref<256x128xf32, #tpu.memory_space<vmem>>, vector<256x128xf32>
    %cst_50 = arith.constant dense<0.000000e+00> : vector<8x128xf32>
    %106 = tpu.matmul %104, %105, %cst_50 {dimension_numbers = #tpu.dot_dimension_numbers<[1], [0], [0], [1], [0, 0, 1, 1], [], []>} : vector<8x256xf32>, vector<256x128xf32>, vector<8x128xf32> -> vector<8x128xf32>
    %c0_51 = arith.constant 0 : index
    %c0_52 = arith.constant 0 : index
    %107 = vector.load %arg11[%c0_51, %c0_52] : memref<1x128xf32, #tpu.memory_space<vmem>>, vector<1x128xf32>
    %108 = vector.broadcast %107 : vector<1x128xf32> to vector<8x128xf32>
    %109 = arith.addf %106, %108 : vector<8x128xf32>
    %110 = vector.shape_cast %109 : vector<8x128xf32> to vector<1x8x128xf32>
    %c0_53 = arith.constant 0 : index
    %c0_54 = arith.constant 0 : index
    %c0_55 = arith.constant 0 : index
    %111 = vector.load %arg13[%c0_53, %c0_54, %c0_55] : memref<1x8x128xf32, #tpu.memory_space<vmem>>, vector<1x8x128xf32>
    tpu.vector_store %arg13[%c0_53, %c0_54, %c0_55], %110 {strides = array<i32>} : memref<1x8x128xf32, #tpu.memory_space<vmem>>, vector<1x8x128xf32>,
    return
  }
  func.func @transform_0(%arg0: i32) -> (i32, i32, i32) {
    %c0_i32 = arith.constant 0 : i32
    %c0_i32_0 = arith.constant 0 : i32
    %c0_i32_1 = arith.constant 0 : i32
    return %arg0, %c0_i32, %c0_i32_0 : i32, i32, i32
  }
  func.func @transform_1(%arg0: i32) -> (i32, i32, i32) {
    %c0_i32 = arith.constant 0 : i32
    %c0_i32_0 = arith.constant 0 : i32
    %c0_i32_1 = arith.constant 0 : i32
    %c0_i32_2 = arith.constant 0 : i32
    return %c0_i32, %c0_i32_0, %c0_i32_1 : i32, i32, i32
  }
  func.func @transform_2(%arg0: i32) -> (i32, i32) {
    %c0_i32 = arith.constant 0 : i32
    %c0_i32_0 = arith.constant 0 : i32
    %c0_i32_1 = arith.constant 0 : i32
    return %c0_i32, %c0_i32_0 : i32, i32
  }
  func.func @transform_3(%arg0: i32) -> (i32, i32, i32) {
    %c0_i32 = arith.constant 0 : i32
    %c0_i32_0 = arith.constant 0 : i32
    %c0_i32_1 = arith.constant 0 : i32
    %c0_i32_2 = arith.constant 0 : i32
    return %c0_i32, %c0_i32_0, %c0_i32_1 : i32, i32, i32
  }
  func.func @transform_4(%arg0: i32) -> (i32, i32) {
    %c0_i32 = arith.constant 0 : i32
    %c0_i32_0 = arith.constant 0 : i32
    %c0_i32_1 = arith.constant 0 : i32
    return %c0_i32, %c0_i32_0 : i32, i32
  }
  func.func @transform_5(%arg0: i32) -> (i32, i32) {
    %c0_i32 = arith.constant 0 : i32
    %c0_i32_0 = arith.constant 0 : i32
    %c0_i32_1 = arith.constant 0 : i32
    return %c0_i32, %c0_i32_0 : i32, i32
  }
  func.func @transform_6(%arg0: i32) -> (i32, i32) {
    %c0_i32 = arith.constant 0 : i32
    %c0_i32_0 = arith.constant 0 : i32
    %c0_i32_1 = arith.constant 0 : i32
    return %c0_i32, %c0_i32_0 : i32, i32
  }
  func.func @transform_7(%arg0: i32) -> (i32, i32) {
    %c0_i32 = arith.constant 0 : i32
    %c0_i32_0 = arith.constant 0 : i32
    %c0_i32_1 = arith.constant 0 : i32
    return %c0_i32, %c0_i32_0 : i32, i32
  }
  func.func @transform_8(%arg0: i32) -> (i32, i32) {
    %c0_i32 = arith.constant 0 : i32
    %c0_i32_0 = arith.constant 0 : i32
    %c0_i32_1 = arith.constant 0 : i32
    return %c0_i32, %c0_i32_0 : i32, i32
  }
  func.func @transform_9(%arg0: i32) -> (i32, i32) {
    %c0_i32 = arith.constant 0 : i32
    %c0_i32_0 = arith.constant 0 : i32
    %c0_i32_1 = arith.constant 0 : i32
    return %c0_i32, %c0_i32_0 : i32, i32
  }
  func.func @transform_10(%arg0: i32) -> (i32, i32) {
    %c0_i32 = arith.constant 0 : i32
    %c0_i32_0 = arith.constant 0 : i32
    %c0_i32_1 = arith.constant 0 : i32
    return %c0_i32, %c0_i32_0 : i32, i32
  }
  func.func @transform_11(%arg0: i32) -> (i32, i32, i32) {
    %c0_i32 = arith.constant 0 : i32
    %c0_i32_0 = arith.constant 0 : i32
    %c0_i32_1 = arith.constant 0 : i32
    return %arg0, %c0_i32, %c0_i32_0 : i32, i32, i32
  }
  func.func @transform_12(%arg0: i32) -> (i32, i32, i32) {
    %c0_i32 = arith.constant 0 : i32
    %c0_i32_0 = arith.constant 0 : i32
    %c0_i32_1 = arith.constant 0 : i32
    return %arg0, %c0_i32, %c0_i32_0 : i32, i32, i32
  }
}

</mosaic_0001>

<bundles_post_ra>
// kernel: _lambda_.1
= control target key start
LH: loop header
LB: loop body
LE: loop exit
PB: predicated region body
PF: predicated region fallthrough
CT: control target
= control target key end

     0   :  { %18 = vsyncpa [#allocation3], 0  ;;  %s2014_s21 = smov 0   ;;  %s2428_s0 = inlined_call_operand.vmem [shape: f32[2,9,108], index: 0, kind: input, shape index: {}]   ;;  %s2429_s1 = inlined_call_operand.vmem [shape: f32[2,108,256], index: 1, kind: input, shape index: {}]   ;;  %s2430_s2 = inlined_call_operand.vmem [shape: f32[1,256], index: 2, kind: input, shape index: {}]   ;;  %s2431_s3 = inlined_call_operand.hbm [shape: f32[3,256,256], index: 3, kind: input, shape index: {}]   ;;  %s2432_s4 = inlined_call_operand.vmem [shape: f32[1,256], index: 4, kind: input, shape index: {}]   ;;  %s2433_s5 = inlined_call_operand.vmem [shape: f32[8,32], index: 5, kind: input, shape index: {}]   ;;  %s2434_s6 = inlined_call_operand.vmem [shape: f32[1,8], index: 6, kind: input, shape index: {}]   ;;  %s2435_s7 = inlined_call_operand.vmem [shape: f32[8,32], index: 7, kind: input, shape index: {}]   ;;  %s2436_s8 = inlined_call_operand.vmem [shape: f32[1,32], index: 8, kind: input, shape index: {}]   ;;  %s2437_s9 = inlined_call_operand.vmem [shape: f32[256,128], index: 9, kind: input, shape index: {}]   ;;  %s2438_s10 = inlined_call_operand.vmem [shape: f32[1,128], index: 10, kind: input, shape index: {}]   ;;  %s2439_s11 = inlined_call_operand.vmem [shape: f32[2,8,256], index: 11, kind: output, shape index: {0}]   ;;  %s2440_s12 = inlined_call_operand.vmem [shape: f32[2,8,128], index: 12, kind: output, shape index: {1}]  }
   0x1 LB: > { %s2020_s22 = sadd.s32 4294967295, %s1938_s21   ;;  %p1470_p0 = scmp.ge.s32.totalorder %s1938_s21, 1  ;;  %s1938_s21 = sphi %s2014_s21, %s24_s21  }
   0x2   : > { %p317_p1 = scmp.lt.s32.totalorder %s1938_s21, 3  ;;  %s1940_s23 = smov [#allocation2]  }
   0x3   : > { %s335_s24 = sshll.u32 %s1940_s23, 4  ;;  %p2441_p3 = scmp.eq.s32.totalorder %s2020_s22, 0  ;;  %s336_s24 = int_to_ptr.vmem [resolvable:$true] %s335_s24 }
   0x4   : > { %p2024_p2 = pnand %p1470_p0, %p317_p1  ;;  %s1900_s29 = scalar_lea.hbm %s2431_s3, 24576 }
   0x5   : > { %p1901_p6 = scmp.ne.s32.totalorder %s2431_s3, %s1900_s29  ;;  %p1907_p10 = scmp.lt.u32.totalorder %s1900_s29, %s2431_s3 }
   0x6   : > { %s2443_s25 = scalar_select %p2024_p2, 1, 0 }
   0x7   : > { %p1851_p4 = pneg %p2024_p2 }
   0x9   : > { %p2033_p5 = pnand %p2441_p3, %p1851_p4 }
   0xb   : > { %p1902_p7 = pneg %p2033_p5 }
   0xd   : > { %p1903_p8 = pnand %p1902_p7, %p1901_p6 }
   0xf   : > { %p1904_p9 = pneg %p1903_p8 }
  0x11   : > { %p1909_p11 = pnand %p1907_p10, %p1904_p9 }
  0x13   : > { %1912 = shalt.err (!%p1909_p11)
}
  0x14   : > { %s1913_s16 = scalar_lea.vmem %s336_s24, 24576  ;;  %p1921_p1 = scmp.lt.s32.totalorder %s336_s24, %s336_s24 }
  0x15   : > { %p1914_p12 = scmp.ne.s32.totalorder %s336_s24, %s1913_s16  ;;  %p1922_p4 = scmp.lt.s32.totalorder %s1913_s16, %s1913_s16 }
  0x17   : > { %p1916_p13 = pnand %p1914_p12, %p1902_p7  ;;  %p1923_p3 = por %p1922_p4, %p1921_p1 }
  0x19   : > { %p1917_p0 = pneg %p1916_p13 }
  0x1b   : > { %p1924_p2 = pnand %p1923_p3, %p1917_p0 }
  0x1d   : > { %1927 = shalt.err (!%p1924_p2)
}
  0x1e   : > { %s1941_s17 = smov 256   ;;  %s1942_s18 = smov 16  }
  0x1f   : > { %1854 = dma.hbm_to_vmem [thread:$0]  (!%p2033_p5), %s2431_s3, 24576, %s336_s24, [#allocation3], %s1941_s17, %s1941_s17, %s1942_s18  }
  0x20   : > { %p2445_p6 = scmp.ne.s32.totalorder %s2443_s25, 0 }
  0x21   : > { %p2446_p8 = scmp.eq.s32.totalorder (!%p2445_p6), %s2020_s22, 0 }
  0x22   : > { %380 = sbr.rel (%p2445_p6) target bundleno = 1496 (0x5d8), region = 64 }
  0x29   : > { %1933 = dma.done.wait (%p2446_p8), [#allocation3], 24576   ;;  %p2447_p7 = pmov %p2446_p8 }
  0x2a   : > { %v1943_v0 = vmov 0.0   ;;  %v1481_v1 = vld [vmem:[%s2429_s1 + $0xe8] sm:$0xff]  ;;  %v1483_v2 = vld [vmem:[%s2429_s1 + $0xf8] sm:$0xff]  ;;  %v1480_v3 = vld [vmem:[%s2429_s1 + $0xe0] sm:$0xff]  ;;  %p426_p2 = scmp.lt.s32.totalorder %s2020_s22, 1  ;;  %vm503_vm0 = vcmask 1043456  }
  0x2b   : > { %1935 = vsyncadd (%p2447_p7), [#allocation3], 4294942720  ;;  %574 = vmatprep.mubr.f32.mxu0 %v1943_v0  ;;  %v1561_v4 = vpack.c.bf16 %v1483_v2, %v1481_v1  ;;  %v1482_v5 = vld [vmem:[%s2429_s1 + $0xf0] sm:$0xff]  ;;  %v1485_v6 = vld [vmem:[%s2429_s1 + $0x108] sm:$0xff]  ;;  %vm1944_vm1 = vmmov 1   ;;  %vm499_vm3 = vcmask 883712  }
  0x2c   : > { %v1487_v7 = vld [vmem:[%s2429_s1 + $0x118] sm:$0xff]  ;;  %v1563_v8 = vpack.c.bf16 %v1482_v5, %v1480_v3  ;;  %v1484_v10 = vld [vmem:[%s2429_s1 + $0x100] sm:$0xff]  ;;  %v1486_v11 = vld [vmem:[%s2429_s1 + $0x110] sm:$0xff]  ;;  %s2451_s22 = smov (!%p426_p2, %s2020_s22), 1  ;;  %vm1104_vm4 = vcmask 1040384   ;;  %vm1115_vm5 = vcmask 1046528  }
  0x2d   : > { %v1565_v9 = vpack.c.bf16 %v1487_v7, %v1485_v6  ;;  %v1489_v12 = vld [vmem:[%s2429_s1 + $0x128] sm:$0xff]  ;;  %1562 = vmatprep.subr.bf16.mxu0 %v1561_v4  ;;  %v1491_v13 = vld [vmem:[%s2429_s1 + $0x138] sm:$0xff]  ;;  %v1567_v14 = vpack.c.bf16 %v1486_v11, %v1484_v10  ;;  %v1488_v16 = vld [vmem:[%s2429_s1 + $0x120] sm:$0xff]  ;;  %s1524_s17 = sshll.u32 %s2451_s22, 4  ;;  %s1945_s23 = smov 32   ;;  %vm1195_vm6 = vcmask 261120  }
  0x2e   : > { %1564 = vmatpush1.bf16.msra.mxu0 %v1563_v8  ;;  %v1569_v15 = vpack.c.bf16 %v1491_v13, %v1489_v12  ;;  %v1490_v17 = vld [vmem:[%s2429_s1 + $0x130] sm:$0xff]  ;;  %v1493_v18 = vld [vmem:[%s2429_s1 + $0x148] sm:$0xff]  ;;  %v1495_v19 = vld [vmem:[%s2429_s1 + $0x158] sm:$0xff]  ;;  %s2172_s28 = scalar_lea.vmem %s2428_s0, %s1524_s17  ;;  %s435_s19 = scalar_lea.vmem %s2439_s11, %s1524_s17  ;;  %vm1250_vm7 = vcmask 523264   ;;  %vm1252_vm8 = vcmask 785408  }
  0x2f   : > { %1566 = vmatprep.subr.bf16.mxu0 %v1565_v9  ;;  %v1571_v20 = vpack.c.bf16 %v1490_v17, %v1488_v16  ;;  %v1573_v21 = vpack.c.bf16 %v1495_v19, %v1493_v18  ;;  %v1492_v22 = vld [vmem:[%s2429_s1 + $0x140] sm:$0xff]  ;;  %v1494_v23 = vld [vmem:[%s2429_s1 + $0x150] sm:$0xff]  ;;  %v1497_v24 = vld [vmem:[%s2429_s1 + $0x168] sm:$0xff]  ;;  %s1946_s27 = smov 96   ;;  %s1947_s26 = smov 64  }
  0x30   : > { %v1499_v25 = vld [vmem:[%s2429_s1 + $0x178] sm:$0xff]  ;;  %v1575_v26 = vpack.c.bf16 %v1494_v23, %v1492_v22  ;;  %v1496_v28 = vld [vmem:[%s2429_s1 + $0x160] sm:$0xff]  ;;  %v1498_v29 = vld [vmem:[%s2429_s1 + $0x170] sm:$0xff] }
  0x31   : > { %v1577_v27 = vpack.c.bf16 %v1499_v25, %v1497_v24  ;;  %v1501_v30 = vld [vmem:[%s2429_s1 + $0x188] sm:$0xff]  ;;  %v1503_v31 = vld [vmem:[%s2429_s1 + $0x198] sm:$0xff]  ;;  %v1579_v32 = vpack.c.bf16 %v1498_v29, %v1496_v28  ;;  %v1500_v34 = vld [vmem:[%s2429_s1 + $0x180] sm:$0xff] }
  0x32   : > { %1568 = vmatpush1.bf16.msra.mxu0 %v1567_v14  ;;  %v1581_v33 = vpack.c.bf16 %v1503_v31, %v1501_v30  ;;  %v1502_v35 = vld [vmem:[%s2429_s1 + $0x190] sm:$0xff]  ;;  %v1505_v36 = vld [vmem:[%s2429_s1 + $0x1a8] sm:$0xff]  ;;  %v1507_v37 = vld [vmem:[%s2429_s1 + $0x1b8] sm:$0xf] }
  0x33   : > { %1570 = vmatprep.subr.bf16.mxu0 %v1569_v15  ;;  %vm2142_vm2 = vmpackc.low %vm503_vm0, %vm1944_vm1  ;;  %v692_v39 = vld [vmem:[#allocation2 + $0x8] sm:$0xff]  ;;  %v694_v40 = vld [vmem:[#allocation2 + $0x18] sm:$0xff]  ;;  %v1583_v41 = vpack.c.bf16 %v1502_v35, %v1500_v34  ;;  %v1585_v46 = vpack.c.bf16 %v1507_v37, %v1505_v36 }
  0x34   : > { %v1504_v42 = vld [vmem:[%s2429_s1 + $0x1a0] sm:$0xff]  ;;  %v1621_v43 = vpack.c.bf16 %v694_v40, %v692_v39  ;;  %v693_v45 = vld [vmem:[#allocation2 + $0x10] sm:$0xff]  ;;  %v442_v48 = vld [vmem:[%s2429_s1 + $0x8] sm:$0xff] }
  0x35   : > { %v691_v44 = vld [vmem:[#allocation2] sm:$0xff]  ;;  %v1506_v47 = vld [vmem:[%s2429_s1 + $0x1b0] sm:$0xf]  ;;  %v444_v49 = vld [vmem:[%s2429_s1 + $0x18] sm:$0xff] }
  0x36   : > { %1572 = vmatpush1.bf16.msra.mxu0 %v1571_v20  ;;  %v1623_v50 = vpack.c.bf16 %v693_v45, %v691_v44  ;;  %1622 = vmatprep.subr.bf16.mxu1 %v1621_v43  ;;  %v696_v51 = vld [vmem:[#allocation2 + $0x28] sm:$0xff]  ;;  %v698_v52 = vld [vmem:[#allocation2 + $0x38] sm:$0xff]  ;;  %v695_v53 = vld [vmem:[#allocation2 + $0x20] sm:$0xff]  ;;  %v1588_v56 = vpack.c.bf16 %v1506_v47, %v1504_v42  ;;  %v1591_v61 = vpack.c.bf16 %v444_v49, %v442_v48 }
  0x37   : > { %1574 = vmatprep.subr.bf16.mxu0 %v1573_v21  ;;  %v1625_v54 = vpack.c.bf16 %v698_v52, %v696_v51  ;;  %v697_v55 = vld [vmem:[#allocation2 + $0x30] sm:$0xff]  ;;  %v441_v57 = vld [vmem:[%s2429_s1] sm:$0xff]  ;;  %v700_v60 = vld [vmem:[#allocation2 + $0x48] sm:$0xff] }
  0x38   : > { %1624 = vmatpush1.bf16.msra.mxu1 %v1623_v50  ;;  %v443_v58 = vld [vmem:[%s2429_s1 + $0x10] sm:$0xff]  ;;  %v1627_v59 = vpack.c.bf16 %v697_v55, %v695_v53  ;;  %v702_v62 = vld [vmem:[#allocation2 + $0x58] sm:$0xff]  ;;  %v699_v63 = vld [vmem:[#allocation2 + $0x40] sm:$0xff] }
  0x39   : > { %1626 = vmatprep.subr.bf16.mxu1 %v1625_v54  ;;  %v701_v1 = vld [vmem:[#allocation2 + $0x50] sm:$0xff]  ;;  %v446_v2 = vld [vmem:[%s2429_s1 + $0x28] sm:$0xff]  ;;  %v448_v3 = vld [vmem:[%s2429_s1 + $0x38] sm:$0xff]  ;;  %v1629_v4 = vpack.c.bf16 %v702_v62, %v700_v60  ;;  %v1593_v9 = vpack.c.bf16 %v443_v58, %v441_v57 }
  0x3a   : > { %1576 = vmatpush1.bf16.msra.mxu0 %v1575_v26  ;;  %v1631_v5 = vpack.c.bf16 %v701_v1, %v699_v63  ;;  %v704_v6 = vld [vmem:[#allocation2 + $0x68] sm:$0xff]  ;;  %v706_v7 = vld [vmem:[#allocation2 + $0x78] sm:$0xff]  ;;  %v703_v10 = vld [vmem:[#allocation2 + $0x60] sm:$0xff]  ;;  %v1595_v12 = vpack.c.bf16 %v448_v3, %v446_v2 }
  0x3b   : > { %1578 = vmatprep.subr.bf16.mxu0 %v1577_v27  ;;  %v469_v8 = vld [vmem:[%s2172_s28 + $0x1] sm:$0xff]  ;;  %v705_v11 = vld [vmem:[#allocation2 + $0x70] sm:$0xff]  ;;  %v1633_v16 = vpack.c.bf16 %v706_v7, %v704_v6  ;;  %v452_v17 = vld [vmem:[%s2429_s1 + $0x58] sm:$0xff] }
  0x3c   : > { %1628 = vmatpush1.bf16.msra.mxu1 %v1627_v59  ;;  %v445_v13 = vld [vmem:[%s2429_s1 + $0x20] sm:$0xff]  ;;  %v447_v14 = vld [vmem:[%s2429_s1 + $0x30] sm:$0xff]  ;;  %v450_v15 = vld [vmem:[%s2429_s1 + $0x48] sm:$0xff]  ;;  %v1635_v20 = vpack.c.bf16 %v705_v11, %v703_v10 }
  0x3d   : > { %1630 = vmatprep.subr.bf16.mxu1 %v1629_v4  ;;  %v708_v18 = vld [vmem:[#allocation2 + $0x88] sm:$0xff]  ;;  %v710_v19 = vld [vmem:[#allocation2 + $0x98] sm:$0xff]  ;;  %v1597_v21 = vpack.c.bf16 %v447_v14, %v445_v13  ;;  %v449_v22 = vld [vmem:[%s2429_s1 + $0x40] sm:$0xff]  ;;  %v1599_v26 = vpack.c.bf16 %v452_v17, %v450_v15 }
  0x3e   : > { %1580 = vmatpush1.bf16.msra.mxu0 %v1579_v32  ;;  %v1637_v23 = vpack.c.bf16 %v710_v19, %v708_v18  ;;  %v707_v24 = vld [vmem:[#allocation2 + $0x80] sm:$0xff]  ;;  %v709_v25 = vld [vmem:[#allocation2 + $0x90] sm:$0xff]  ;;  %v712_v28 = vld [vmem:[#allocation2 + $0xa8] sm:$0xff] }
  0x3f   : > { %1582 = vmatprep.subr.bf16.mxu0 %v1581_v33  ;;  %v451_v27 = vld [vmem:[%s2429_s1 + $0x50] sm:$0xff]  ;;  %v714_v29 = vld [vmem:[#allocation2 + $0xb8] sm:$0xff]  ;;  %v454_v30 = vld [vmem:[%s2429_s1 + $0x68] sm:$0xff]  ;;  %v1639_v31 = vpack.c.bf16 %v709_v25, %v707_v24 }
  0x40   : > { %1632 = vmatpush1.bf16.msra.mxu1 %v1631_v5  ;;  %v1601_v32 = vpack.c.bf16 %v451_v27, %v449_v22  ;;  %v453_v33 = vld [vmem:[%s2429_s1 + $0x60] sm:$0xff]  ;;  %v1641_v34 = vpack.c.bf16 %v714_v29, %v712_v28  ;;  %v713_v36 = vld [vmem:[#allocation2 + $0xb0] sm:$0xff]  ;;  %v716_v40 = vld [vmem:[#allocation2 + $0xc8] sm:$0xff] }
  0x41   : > { %1634 = vmatprep.subr.bf16.mxu1 %v1633_v16  ;;  %v711_v35 = vld [vmem:[#allocation2 + $0xa0] sm:$0xff]  ;;  %v455_v39 = vld [vmem:[%s2429_s1 + $0x70] sm:$0xff]  ;;  %v458_v42 = vld [vmem:[%s2429_s1 + $0x88] sm:$0xff] }
  0x42   : > { %1584 = vmatpush1.bf16.msra.mxu0 %v1583_v41  ;;  %v718_v41 = vld [vmem:[#allocation2 + $0xd8] sm:$0xff]  ;;  %v1643_v44 = vpack.c.bf16 %v713_v36, %v711_v35  ;;  %v1605_v45 = vpack.c.bf16 %v455_v39, %v453_v33  ;;  %v715_v48 = vld [vmem:[#allocation2 + $0xc0] sm:$0xff]  ;;  %v717_v49 = vld [vmem:[#allocation2 + $0xd0] sm:$0xff] }
  0x43   : > { %1587 = vmatprep.subr.msk.bf16.mxu0 %vm2142_vm2, %v1585_v46  ;;  %v460_v43 = vld [vmem:[%s2429_s1 + $0x98] sm:$0xff]  ;;  %v457_v46 = vld [vmem:[%s2429_s1 + $0x80] sm:$0xff]  ;;  %v1645_v47 = vpack.c.bf16 %v718_v41, %v716_v40  ;;  %v459_v51 = vld [vmem:[%s2429_s1 + $0x90] sm:$0xff] }
  0x44   : > { %1636 = vmatpush1.bf16.msra.mxu1 %v1635_v20  ;;  %v1607_v50 = vpack.c.bf16 %v460_v43, %v458_v42  ;;  %v720_v52 = vld [vmem:[#allocation2 + $0xe8] sm:$0xff]  ;;  %v722_v53 = vld [vmem:[#allocation2 + $0xf8] sm:$0xff]  ;;  %v1609_v57 = vpack.c.bf16 %v459_v51, %v457_v46  ;;  %v719_v59 = vld [vmem:[#allocation2 + $0xe0] sm:$0xff] }
  0x45   : > { %1638 = vmatprep.subr.bf16.mxu1 %v1637_v23  ;;  %v462_v54 = vld [vmem:[%s2429_s1 + $0xa8] sm:$0xff]  ;;  %v464_v55 = vld [vmem:[%s2429_s1 + $0xb8] sm:$0xff]  ;;  %v1649_v58 = vpack.c.bf16 %v722_v53, %v720_v52  ;;  %v721_v60 = vld [vmem:[#allocation2 + $0xf0] sm:$0xff] }
  0x46   : > { %1590 = vmatpush1.bf16.msk.msra.mxu0 %vm2142_vm2, %v1588_v56  ;;  %v1647_v56 = vpack.c.bf16 %v717_v49, %v715_v48  ;;  %v461_v62 = vld [vmem:[%s2429_s1 + $0xa0] sm:$0xff]  ;;  %v463_v63 = vld [vmem:[%s2429_s1 + $0xb0] sm:$0xff]  ;;  %v466_v1 = vld [vmem:[%s2429_s1 + $0xc8] sm:$0xff]  ;;  %v1651_v3 = vpack.c.bf16 %v721_v60, %v719_v59 }
  0x47   : > { %1592 = vmatprep.subr.bf16.mxu0 %v1591_v61  ;;  %v1611_v61 = vpack.c.bf16 %v464_v55, %v462_v54  ;;  %v468_v2 = vld [vmem:[%s2429_s1 + $0xd8] sm:$0xf]  ;;  %v1613_v4 = vpack.c.bf16 %v463_v63, %v461_v62  ;;  %v465_v6 = vld [vmem:[%s2429_s1 + $0xc0] sm:$0xff]  ;;  %v467_v7 = vld [vmem:[%s2429_s1 + $0xd0] sm:$0xf] }
  0x48   : > { %1640 = vmatpush1.bf16.msra.mxu1 %v1639_v31  ;;  %v1615_v5 = vpack.c.bf16 %v468_v2, %v466_v1  ;;  %v1618_v10 = vpack.c.bf16 %v467_v7, %v465_v6  ;;  %v829_v13 = vld [vmem:[#allocation2 + $0x210] sm:$0xff]  ;;  %v832_v14 = vld [vmem:[#allocation2 + $0x228] sm:$0xff]  ;;  %v834_v15 = vld [vmem:[#allocation2 + $0x238] sm:$0xff] }
  0x49   : > { %1510 = vmatmul.mubr.msk.f32.vlgmr.msra.gmra.mrb[0].mxu0 %vm499_vm3, %v469_v8  ;;  %1642 = vmatprep.subr.bf16.mxu1 %v1641_v34  ;;  %v828_v8 = vld [vmem:[#allocation2 + $0x208] sm:$0xff]  ;;  %v440_v16 = vld [vmem:[%s2172_s28] sm:$0xff]  ;;  %v1689_v18 = vpack.c.bf16 %v834_v15, %v832_v14  ;;  %v833_v20 = vld [vmem:[#allocation2 + $0x230] sm:$0xff] }
  0x4a   : > { %1594 = vmatpush1.bf16.msra.mxu0 %v1593_v9  ;;  %654 = vmatprep.mubr.f32.mxu0 %v1943_v0  ;;  %v456_v0 = vld [vmem:[%s2429_s1 + $0x78] sm:$0xff]  ;;  %v831_v19 = vld [vmem:[#allocation2 + $0x220] sm:$0xff]  ;;  %v840_v27 = vld [vmem:[#allocation2 + $0x268] sm:$0xff] }
  0x4b   : > { %1596 = vmatprep.subr.bf16.mxu0 %v1595_v12  ;;  %v1603_v37 = vpack.c.bf16 %v456_v0, %v454_v30  ;;  %v830_v9 = vld [vmem:[#allocation2 + $0x218] sm:$0xff]  ;;  %v827_v12 = vld [vmem:[#allocation2 + $0x200] sm:$0xff]  ;;  %v1691_v23 = vpack.c.bf16 %v833_v20, %v831_v19  ;;  %v841_v0 = vld [vmem:[#allocation2 + $0x270] sm:$0xff] }
  0x4c   : > { %1644 = vmatpush1.bf16.msra.mxu1 %v1643_v44  ;;  %v1685_v11 = vpack.c.bf16 %v830_v9, %v828_v8  ;;  %v1687_v17 = vpack.c.bf16 %v829_v13, %v827_v12  ;;  %v838_v22 = vld [vmem:[#allocation2 + $0x258] sm:$0xff]  ;;  %v835_v25 = vld [vmem:[#allocation2 + $0x240] sm:$0xff]  ;;  %v844_v31 = vld [vmem:[#allocation2 + $0x288] sm:$0xff] }
  0x4d   : > { %1646 = vmatprep.subr.bf16.mxu1 %v1645_v47  ;;  %v842_v28 = vld [vmem:[#allocation2 + $0x278] sm:$0xff]  ;;  %v839_v30 = vld [vmem:[#allocation2 + $0x260] sm:$0xff]  ;;  %v845_v36 = vld [vmem:[#allocation2 + $0x290] sm:$0xff] }
  0x4e   : > { %1598 = vmatpush1.bf16.msra.mxu0 %v1597_v21  ;;  %v836_v21 = vld [vmem:[#allocation2 + $0x248] sm:$0xff]  ;;  %v1697_v29 = vpack.c.bf16 %v842_v28, %v840_v27  ;;  %v1699_v33 = vpack.c.bf16 %v841_v0, %v839_v30  ;;  %v843_v35 = vld [vmem:[#allocation2 + $0x280] sm:$0xff]  ;;  %v850_v39 = vld [vmem:[#allocation2 + $0x2b8] sm:$0xff] }
  0x4f   : > { %1600 = vmatprep.subr.bf16.mxu0 %v1599_v26  ;;  %v1693_v24 = vpack.c.bf16 %v838_v22, %v836_v21  ;;  %v837_v26 = vld [vmem:[#allocation2 + $0x250] sm:$0xff]  ;;  %v1703_v40 = vpack.c.bf16 %v845_v36, %v843_v35  ;;  %v847_v42 = vld [vmem:[#allocation2 + $0x2a0] sm:$0xff]  ;;  %v852_v44 = vld [vmem:[#allocation2 + $0x2c8] sm:$0xff] }
  0x50   : > { %1648 = vmatpush1.bf16.msra.mxu1 %v1647_v56  ;;  %v1695_v38 = vpack.c.bf16 %v837_v26, %v835_v25  ;;  %v849_v43 = vld [vmem:[#allocation2 + $0x2b0] sm:$0xff]  ;;  %v851_v48 = vld [vmem:[#allocation2 + $0x2c0] sm:$0xff]  ;;  %v858_v51 = vld [vmem:[#allocation2 + $0x2f8] sm:$0xff] }
  0x51   : > { %1650 = vmatprep.subr.bf16.mxu1 %v1649_v58  ;;  %v1707_v46 = vpack.c.bf16 %v849_v43, %v847_v42  ;;  %v853_v49 = vld [vmem:[#allocation2 + $0x2d0] sm:$0xff]  ;;  %v855_v54 = vld [vmem:[#allocation2 + $0x2e0] sm:$0xff]  ;;  %v726_v58 = vld [vmem:[#allocation2 + $0x118] sm:$0xff] }
  0x52   : > { %1602 = vmatpush1.bf16.msra.mxu0 %v1601_v32  ;;  %v846_v32 = vld [vmem:[#allocation2 + $0x298] sm:$0xff]  ;;  %v1711_v52 = vpack.c.bf16 %v853_v49, %v851_v48  ;;  %v857_v55 = vld [vmem:[#allocation2 + $0x2f0] sm:$0xff]  ;;  %v723_v60 = vld [vmem:[#allocation2 + $0x100] sm:$0xff] }
  0x53   : > { %1604 = vmatprep.subr.bf16.mxu0 %v1603_v37  ;;  %v1701_v34 = vpack.c.bf16 %v846_v32, %v844_v31  ;;  %v848_v37 = vld [vmem:[#allocation2 + $0x2a8] sm:$0xff]  ;;  %v1715_v56 = vpack.c.bf16 %v857_v55, %v855_v54  ;;  %v862_v1 = vld [vmem:[#allocation2 + $0x318] sm:$0xff]  ;;  %v859_v2 = vld [vmem:[#allocation2 + $0x300] sm:$0xff] }
  0x54   : > { %1652 = vmatpush1.bf16.msra.mxu1 %v1651_v3  ;;  %v1705_v41 = vpack.c.bf16 %v850_v39, %v848_v37  ;;  %v860_v63 = vld [vmem:[#allocation2 + $0x308] sm:$0xff]  ;;  %v730_v7 = vld [vmem:[#allocation2 + $0x138] sm:$0xff]  ;;  %v727_v9 = vld [vmem:[#allocation2 + $0x120] sm:$0xff] }
  0x55   : > { %v1717_v3 = vpack.c.bf16 %v862_v1, %v860_v63  ;;  %v728_v6 = vld [vmem:[#allocation2 + $0x128] sm:$0xff]  ;;  %v866_v13 = vld [vmem:[#allocation2 + $0x338] sm:$0xff]  ;;  %v863_v14 = vld [vmem:[#allocation2 + $0x320] sm:$0xff] }
  0x56   : > { %1606 = vmatpush1.bf16.msra.mxu0 %v1605_v45  ;;  %v854_v45 = vld [vmem:[#allocation2 + $0x2d8] sm:$0xff]  ;;  %v1657_v8 = vpack.c.bf16 %v730_v7, %v728_v6  ;;  %v865_v15 = vld [vmem:[#allocation2 + $0x330] sm:$0xff]  ;;  %v731_v21 = vld [vmem:[#allocation2 + $0x140] sm:$0xff] }
  0x57   : > { %1608 = vmatprep.subr.bf16.mxu0 %v1607_v50  ;;  %v1709_v47 = vpack.c.bf16 %v854_v45, %v852_v44  ;;  %v856_v50 = vld [vmem:[#allocation2 + $0x2e8] sm:$0xff]  ;;  %v734_v19 = vld [vmem:[#allocation2 + $0x158] sm:$0xff]  ;;  %v733_v22 = vld [vmem:[#allocation2 + $0x150] sm:$0xff] }
  0x58   : > { %v1713_v53 = vpack.c.bf16 %v858_v51, %v856_v50  ;;  %v870_v25 = vld [vmem:[#allocation2 + $0x358] sm:$0xff]  ;;  %v867_v26 = vld [vmem:[#allocation2 + $0x340] sm:$0xff]  ;;  %v869_v27 = vld [vmem:[#allocation2 + $0x350] sm:$0xff] }
  0x59   : > { %v738_v30 = vld [vmem:[#allocation2 + $0x178] sm:$0xff]  ;;  %v735_v31 = vld [vmem:[#allocation2 + $0x160] sm:$0xff]  ;;  %v737_v32 = vld [vmem:[#allocation2 + $0x170] sm:$0xff] }
  0x5a   : > { %1610 = vmatpush1.bf16.msra.mxu0 %v1609_v57  ;;  %v724_v57 = vld [vmem:[#allocation2 + $0x108] sm:$0xff]  ;;  %v874_v35 = vld [vmem:[#allocation2 + $0x378] sm:$0xff]  ;;  %v871_v36 = vld [vmem:[#allocation2 + $0x360] sm:$0xff] }
  0x5b   : > { %1612 = vmatprep.subr.bf16.mxu0 %v1611_v61  ;;  %v1653_v59 = vpack.c.bf16 %v726_v58, %v724_v57  ;;  %v725_v61 = vld [vmem:[#allocation2 + $0x110] sm:$0xff]  ;;  %v742_v42 = vld [vmem:[#allocation2 + $0x198] sm:$0xff]  ;;  %v739_v44 = vld [vmem:[#allocation2 + $0x180] sm:$0xff] }
  0x5c   : > { %v1655_v62 = vpack.c.bf16 %v725_v61, %v723_v60  ;;  %v873_v37 = vld [vmem:[#allocation2 + $0x370] sm:$0xff]  ;;  %v878_v48 = vld [vmem:[#allocation2 + $0x398] sm:$0xff]  ;;  %v875_v49 = vld [vmem:[#allocation2 + $0x380] sm:$0xff] }
  0x5d   : > { %1654 = vmatprep.subr.bf16.mxu1 %v1653_v59  ;;  %v741_v45 = vld [vmem:[#allocation2 + $0x190] sm:$0xff]  ;;  %v746_v54 = vld [vmem:[#allocation2 + $0x1b8] sm:$0xff]  ;;  %v880_v58 = vld [vmem:[#allocation2 + $0x3a8] sm:$0xff] }
  0x5e   : > { %1614 = vmatpush1.bf16.msra.mxu0 %v1613_v4  ;;  %v861_v4 = vld [vmem:[#allocation2 + $0x310] sm:$0xff]  ;;  %1656 = vmatpush1.bf16.msra.mxu1 %v1655_v62  ;;  %v882_v60 = vld [vmem:[#allocation2 + $0x3b8] sm:$0xff]  ;;  %v879_v61 = vld [vmem:[#allocation2 + $0x3a0] sm:$0xff] }
  0x5f   : > { %1617 = vmatprep.subr.msk.bf16.mxu0 %vm2142_vm2, %v1615_v5  ;;  %v1719_v5 = vpack.c.bf16 %v861_v4, %v859_v2  ;;  %1658 = vmatprep.subr.bf16.mxu1 %v1657_v8  ;;  %v877_v50 = vld [vmem:[#allocation2 + $0x390] sm:$0xff]  ;;  %v1737_v63 = vpack.c.bf16 %v882_v60, %v880_v58  ;;  %v748_v2 = vld [vmem:[#allocation2 + $0x1c8] sm:$0xff]  ;;  %v974_v58 = vld [vmem:[#allocation2 + $0x458] sm:$0xff] }
  0x60   : > { %v745_v57 = vld [vmem:[#allocation2 + $0x1b0] sm:$0xff]  ;;  %v884_v7 = vld [vmem:[#allocation2 + $0x3c8] sm:$0xff] }
  0x61   : > { %v881_v62 = vld [vmem:[#allocation2 + $0x3b0] sm:$0xff] }
  0x62   : > { %1620 = vmatpush1.bf16.msk.msra.mxu0 %vm2142_vm2, %v1618_v10  ;;  %v729_v10 = vld [vmem:[#allocation2 + $0x130] sm:$0xff]  ;;  %v1739_v1 = vpack.c.bf16 %v881_v62, %v879_v61  ;;  %v971_v61 = vld [vmem:[#allocation2 + $0x440] sm:$0xff] }
  0x63   : > { %1686 = vmatprep.subr.bf16.mxu0 %v1685_v11  ;;  %v864_v11 = vld [vmem:[#allocation2 + $0x328] sm:$0xff]  ;;  %v1659_v12 = vpack.c.bf16 %v729_v10, %v727_v9  ;;  %v749_v6 = vld [vmem:[#allocation2 + $0x1d0] sm:$0xff]  ;;  %v886_v9 = vld [vmem:[#allocation2 + $0x3d8] sm:$0xff] }
  0x64   : > { %v883_v10 = vld [vmem:[#allocation2 + $0x3c0] sm:$0xff]  ;;  %v973_v62 = vld [vmem:[#allocation2 + $0x450] sm:$0xff] }
  0x65   : > { %1513 = vmatmul.mubr.msk.f32.vlgmr.msra.gmra.mrb[0].mxu0 %vm499_vm3, %v440_v16  ;;  %v1721_v16 = vpack.c.bf16 %v866_v13, %v864_v11  ;;  %1660 = vmatpush1.bf16.msra.mxu1 %v1659_v12  ;;  %v885_v11 = vld [vmem:[#allocation2 + $0x3d0] sm:$0xff]  ;;  %v1741_v12 = vpack.c.bf16 %v886_v9, %v884_v7  ;;  %v982_v7 = vld [vmem:[#allocation2 + $0x498] sm:$0xff] }
  0x66   : > { %1688 = vmatpush1.bf16.msra.mxu0 %v1687_v17  ;;  %v1723_v17 = vpack.c.bf16 %v865_v15, %v863_v14  ;;  %v1743_v13 = vpack.c.bf16 %v885_v11, %v883_v10  ;;  %v752_v14 = vld [vmem:[#allocation2 + $0x1e8] sm:$0xff]  ;;  %v754_v15 = vld [vmem:[#allocation2 + $0x1f8] sm:$0xff]  ;;  %v979_v10 = vld [vmem:[#allocation2 + $0x480] sm:$0xff] }
  0x67   : > { %1690 = vmatprep.subr.bf16.mxu0 %v1689_v18  ;;  %v732_v18 = vld [vmem:[#allocation2 + $0x148] sm:$0xff]  ;;  %v981_v11 = vld [vmem:[#allocation2 + $0x490] sm:$0xff] }
  0x68   : > { %v1661_v20 = vpack.c.bf16 %v734_v19, %v732_v18  ;;  %v753_v18 = vld [vmem:[#allocation2 + $0x1f0] sm:$0xff]  ;;  %v888_v19 = vld [vmem:[#allocation2 + $0x3e8] sm:$0xff] }
  0x6a   : > { %1692 = vmatpush1.bf16.msra.mxu0 %v1691_v23  ;;  %v868_v23 = vld [vmem:[#allocation2 + $0x348] sm:$0xff]  ;;  %1662 = vmatprep.subr.bf16.mxu1 %v1661_v20 }
  0x6b   : > { %1694 = vmatprep.subr.bf16.mxu0 %v1693_v24  ;;  %v1663_v24 = vpack.c.bf16 %v733_v22, %v731_v21  ;;  %v1725_v28 = vpack.c.bf16 %v870_v25, %v868_v23  ;;  %v890_v21 = vld [vmem:[#allocation2 + $0x3f8] sm:$0xff]  ;;  %v887_v22 = vld [vmem:[#allocation2 + $0x3e0] sm:$0xff]  ;;  %v889_v23 = vld [vmem:[#allocation2 + $0x3f0] sm:$0xff] }
  0x6c   : > { %v1747_v25 = vpack.c.bf16 %v889_v23, %v887_v22  ;;  %v987_v22 = vld [vmem:[#allocation2 + $0x4c0] sm:$0xff]  ;;  %v989_v23 = vld [vmem:[#allocation2 + $0x4d0] sm:$0xff] }
  0x6d   : > { %1664 = vmatpush1.bf16.msra.mxu1 %v1663_v24  ;;  %v1745_v24 = vpack.c.bf16 %v890_v21, %v888_v19  ;;  %v990_v19 = vld [vmem:[#allocation2 + $0x4d8] sm:$0xff] }
  0x6e   : > { %1696 = vmatpush1.bf16.msra.mxu0 %v1695_v38  ;;  %v1727_v38 = vpack.c.bf16 %v869_v27, %v867_v26  ;;  %v964_v26 = vld [vmem:[#allocation2 + $0x408] sm:$0xff]  ;;  %v966_v27 = vld [vmem:[#allocation2 + $0x418] sm:$0xff] }
  0x6f   : > { %1698 = vmatprep.subr.bf16.mxu0 %v1697_v29  ;;  %v736_v29 = vld [vmem:[#allocation2 + $0x168] sm:$0xff] }
  0x70   : > { %v1665_v0 = vpack.c.bf16 %v738_v30, %v736_v29 }
  0x72   : > { %1700 = vmatpush1.bf16.msra.mxu0 %v1699_v33  ;;  %v872_v33 = vld [vmem:[#allocation2 + $0x368] sm:$0xff]  ;;  %1666 = vmatprep.subr.bf16.mxu1 %v1665_v0  ;;  %v661_v0 = vld [vmem:[%s2430_s2] sm:$0x3] }
  0x73   : > { %1702 = vmatprep.subr.bf16.mxu0 %v1701_v34  ;;  %v1667_v34 = vpack.c.bf16 %v737_v32, %v735_v31  ;;  %v1729_v39 = vpack.c.bf16 %v874_v35, %v872_v33 }
  0x75   : > { %1668 = vmatpush1.bf16.msra.mxu1 %v1667_v34 }
  0x76   : > { %1704 = vmatpush1.bf16.msra.mxu0 %v1703_v40  ;;  %v1731_v40 = vpack.c.bf16 %v873_v37, %v871_v36 }
  0x77   : > { %1706 = vmatprep.subr.bf16.mxu0 %v1705_v41  ;;  %v740_v41 = vld [vmem:[#allocation2 + $0x188] sm:$0xff] }
  0x78   : > { %v1669_v43 = vpack.c.bf16 %v742_v42, %v740_v41 }
  0x7a   : > { %1708 = vmatpush1.bf16.msra.mxu0 %v1707_v46  ;;  %v876_v46 = vld [vmem:[#allocation2 + $0x388] sm:$0xff]  ;;  %1670 = vmatprep.subr.bf16.mxu1 %v1669_v43 }
  0x7b   : > { %1710 = vmatprep.subr.bf16.mxu0 %v1709_v47  ;;  %v1671_v47 = vpack.c.bf16 %v741_v45, %v739_v44  ;;  %v1733_v51 = vpack.c.bf16 %v878_v48, %v876_v46  ;;  %v963_v45 = vld [vmem:[#allocation2 + $0x400] sm:$0xff]  ;;  %v965_v46 = vld [vmem:[#allocation2 + $0x410] sm:$0xff]  ;;  %v968_v48 = vld [vmem:[#allocation2 + $0x428] sm:$0xff] }
  0x7d   : > { %1672 = vmatpush1.bf16.msra.mxu1 %v1671_v47 }
  0x7e   : > { %1712 = vmatpush1.bf16.msra.mxu0 %v1711_v52  ;;  %v1735_v52 = vpack.c.bf16 %v877_v50, %v875_v49  ;;  %v970_v49 = vld [vmem:[#allocation2 + $0x438] sm:$0xff] }
  0x7f   : > { %1714 = vmatprep.subr.bf16.mxu0 %v1713_v53  ;;  %v744_v53 = vld [vmem:[#allocation2 + $0x1a8] sm:$0xff] }
  0x80   : > { %v1673_v55 = vpack.c.bf16 %v746_v54, %v744_v53  ;;  %v1751_v53 = vpack.c.bf16 %v965_v46, %v963_v45  ;;  %v1753_v54 = vpack.c.bf16 %v970_v49, %v968_v48  ;;  %v1006_v45 = vld [vmem:[#allocation2 + $0x558] sm:$0xff]  ;;  %v1003_v48 = vld [vmem:[#allocation2 + $0x540] sm:$0xff]  ;;  %v1005_v49 = vld [vmem:[#allocation2 + $0x550] sm:$0xff] }
  0x82   : > { %1716 = vmatpush1.bf16.msra.mxu0 %v1715_v56  ;;  %v743_v56 = vld [vmem:[#allocation2 + $0x1a0] sm:$0xff]  ;;  %1674 = vmatprep.subr.bf16.mxu1 %v1673_v55 }
  0x83   : > { %1718 = vmatprep.subr.bf16.mxu0 %v1717_v3  ;;  %v1675_v59 = vpack.c.bf16 %v745_v57, %v743_v56  ;;  %v750_v3 = vld [vmem:[#allocation2 + $0x1d8] sm:$0xff]  ;;  %v967_v55 = vld [vmem:[#allocation2 + $0x420] sm:$0xff]  ;;  %v969_v56 = vld [vmem:[#allocation2 + $0x430] sm:$0xff] }
  0x84   : > { %v1677_v4 = vpack.c.bf16 %v750_v3, %v748_v2  ;;  %v972_v57 = vld [vmem:[#allocation2 + $0x448] sm:$0xff]  ;;  %v1759_v2 = vpack.c.bf16 %v973_v62, %v971_v61  ;;  %v1011_v61 = vld [vmem:[#allocation2 + $0x580] sm:$0xff]  ;;  %v1013_v62 = vld [vmem:[#allocation2 + $0x590] sm:$0xff] }
  0x85   : > { %1676 = vmatpush1.bf16.msra.mxu1 %v1675_v59  ;;  %v1755_v59 = vpack.c.bf16 %v969_v56, %v967_v55  ;;  %v1757_v60 = vpack.c.bf16 %v974_v58, %v972_v57  ;;  %v1007_v55 = vld [vmem:[#allocation2 + $0x560] sm:$0xff]  ;;  %v1009_v56 = vld [vmem:[#allocation2 + $0x570] sm:$0xff]  ;;  %v1012_v57 = vld [vmem:[#allocation2 + $0x588] sm:$0xff] }
  0x86   : > { %1720 = vmatpush1.bf16.msra.mxu0 %v1719_v5  ;;  %v747_v5 = vld [vmem:[#allocation2 + $0x1c0] sm:$0xff]  ;;  %1678 = vmatprep.subr.bf16.mxu1 %v1677_v4  ;;  %v1014_v58 = vld [vmem:[#allocation2 + $0x598] sm:$0xff] }
  0x87   : > { %1722 = vmatprep.subr.bf16.mxu0 %v1721_v16  ;;  %v1679_v8 = vpack.c.bf16 %v749_v6, %v747_v5  ;;  %v1681_v16 = vpack.c.bf16 %v754_v15, %v752_v14  ;;  %v975_v4 = vld [vmem:[#allocation2 + $0x460] sm:$0xff]  ;;  %v977_v5 = vld [vmem:[#allocation2 + $0x470] sm:$0xff]  ;;  %v980_v6 = vld [vmem:[#allocation2 + $0x488] sm:$0xff]  ;;  %v1767_v14 = vpack.c.bf16 %v981_v11, %v979_v10 }
  0x88   : > { %v1765_v9 = vpack.c.bf16 %v982_v7, %v980_v6  ;;  %v1020_v6 = vld [vmem:[#allocation2 + $0x5c8] sm:$0xff]  ;;  %v1022_v7 = vld [vmem:[#allocation2 + $0x5d8] sm:$0xff]  ;;  %v1019_v10 = vld [vmem:[#allocation2 + $0x5c0] sm:$0xff] }
  0x89   : > { %1680 = vmatpush1.bf16.msra.mxu1 %v1679_v8  ;;  %v1763_v8 = vpack.c.bf16 %v977_v5, %v975_v4  ;;  %v1015_v4 = vld [vmem:[#allocation2 + $0x5a0] sm:$0xff]  ;;  %v1017_v5 = vld [vmem:[#allocation2 + $0x5b0] sm:$0xff] }
  0x8a   : > { %1724 = vmatpush1.bf16.msra.mxu0 %v1723_v17  ;;  %v751_v17 = vld [vmem:[#allocation2 + $0x1e0] sm:$0xff]  ;;  %1682 = vmatprep.subr.bf16.mxu1 %v1681_v16  ;;  %v1021_v11 = vld [vmem:[#allocation2 + $0x5d0] sm:$0xff] }
  0x8b   : > { %1726 = vmatprep.subr.bf16.mxu0 %v1725_v28  ;;  %v1683_v20 = vpack.c.bf16 %v753_v18, %v751_v17  ;;  %v1749_v28 = vpack.c.bf16 %v966_v27, %v964_v26  ;;  %v983_v16 = vld [vmem:[#allocation2 + $0x4a0] sm:$0xff]  ;;  %v985_v17 = vld [vmem:[#allocation2 + $0x4b0] sm:$0xff]  ;;  %v988_v18 = vld [vmem:[#allocation2 + $0x4c8] sm:$0xff]  ;;  %v1775_v26 = vpack.c.bf16 %v989_v23, %v987_v22 }
  0x8c   : > { %v1773_v21 = vpack.c.bf16 %v990_v19, %v988_v18 }
  0x8d   : > { %1684 = vmatpush1.bf16.msra.mxu1 %v1683_v20  ;;  %v1771_v20 = vpack.c.bf16 %v985_v17, %v983_v16  ;;  %v1023_v16 = vld [vmem:[#allocation2 + $0x5e0] sm:$0xff]  ;;  %v1025_v17 = vld [vmem:[#allocation2 + $0x5f0] sm:$0xff] }
  0x8e   : > { %1728 = vmatpush1.bf16.msra.mxu0 %v1727_v38  ;;  %1750 = vmatprep.subr.bf16.mxu1 %v1749_v28  ;;  %v663_v38 = vlaneseq  ;;  %v991_v28 = vld [vmem:[#allocation2 + $0x4e0] sm:$0xff]  ;;  %v1811_v18 = vpack.c.bf16 %v1025_v17, %v1023_v16 }
  0x8f   : > { %1730 = vmatprep.subr.bf16.mxu0 %v1729_v39  ;;  %v1189_v16 = vld [vmem:[%s2433_s5] sm:$0xff] }
  0x90   : > { %v2257_v29 = vshrl.u32 %v663_v38, 7  ;;  %v993_v38 = vld [vmem:[#allocation2 + $0x4f0] sm:$0xff] }
  0x92   : > { %1732 = vmatpush1.bf16.msra.mxu0 %v1731_v40  ;;  %v2260_v30 = vsub.s32 0, %v2257_v29  ;;  %v669_v31 = vsub.s32 1, %v2257_v29 }
  0x93   : > { %1734 = vmatprep.subr.bf16.mxu0 %v1733_v51 }
  0x94   : > { %v666_v32 = vrot.slane %v661_v0, %v2260_v30  ;;  %v670_v33 = vrot.slane %v661_v0, %v669_v31  ;;  %v996_v0 = vld [vmem:[#allocation2 + $0x508] sm:$0xff] }
  0x96   : > { %1736 = vmatpush1.bf16.msra.mxu0 %v1735_v52 }
  0x97   : > { %1738 = vmatprep.subr.bf16.mxu0 %v1737_v63  ;;  %v976_v63 = vld [vmem:[#allocation2 + $0x468] sm:$0xff] }
  0x9a   : > { %1740 = vmatpush1.bf16.msra.mxu0 %v1739_v1  ;;  %v978_v1 = vld [vmem:[#allocation2 + $0x478] sm:$0xff] }
  0x9b   : > { %1742 = vmatprep.subr.bf16.mxu0 %v1741_v12  ;;  %v1761_v3 = vpack.c.bf16 %v978_v1, %v976_v63  ;;  %v984_v12 = vld [vmem:[#allocation2 + $0x4a8] sm:$0xff]  ;;  %v1018_v1 = vld [vmem:[#allocation2 + $0x5b8] sm:$0xff] }
  0x9c   : > { %v1016_v63 = vld [vmem:[#allocation2 + $0x5a8] sm:$0xff] }
  0x9e   : > { %1744 = vmatpush1.bf16.msra.mxu0 %v1743_v13  ;;  %v986_v13 = vld [vmem:[#allocation2 + $0x4b8] sm:$0xff] }
  0x9f   : > { %1746 = vmatprep.subr.bf16.mxu0 %v1745_v24  ;;  %v1769_v15 = vpack.c.bf16 %v986_v13, %v984_v12  ;;  %v992_v24 = vld [vmem:[#allocation2 + $0x4e8] sm:$0xff]  ;;  %v1026_v13 = vld [vmem:[#allocation2 + $0x5f8] sm:$0xff] }
  0xa0   : > { %v1024_v12 = vld [vmem:[#allocation2 + $0x5e8] sm:$0xff] }
  0xa2   : > { %1748 = vmatpush1.bf16.msra.mxu0 %v1747_v25  ;;  %v994_v25 = vld [vmem:[#allocation2 + $0x4f8] sm:$0xff] }
  0xa3   : > { %v1777_v27 = vpack.c.bf16 %v994_v25, %v992_v24 }
 0x138   : > { %v656_v34 = vpop.f32.mrb[0].mxu0 }
 0x139   : > { %v673_v35 = vadd.f32 %v666_v32, %v656_v34  ;;  %v658_v36 = vpop.f32.mrb[1].mxu0  ;;  %v998_v32 = vld [vmem:[#allocation2 + $0x518] sm:$0xff] }
 0x13a   : > { %v674_v37 = vadd.f32 %v670_v33, %v658_v36  ;;  %v1779_v33 = vpack.c.bf16 %v993_v38, %v991_v28  ;;  %v1781_v34 = vpack.c.bf16 %v998_v32, %v996_v0  ;;  %v997_v36 = vld [vmem:[#allocation2 + $0x510] sm:$0xff]  ;;  %v1120_v38 = vld [vmem:[%s2432_s4] sm:$0x3] }
 0x13b   : > { %v1514_v39 = vmul.f32 -1.442695, %v673_v35 }
 0x13c   : > { %v1515_v40 = vmul.f32 -1.442695, %v674_v37 }
 0x13d   : > { %1876 = vpow2.f32 %v1514_v39  ;;  %v1002_v39 = vld [vmem:[#allocation2 + $0x538] sm:$0xff] }
 0x13e   : > { %1878 = vpow2.f32 %v1515_v40 }
 0x147   : > { %v1877_v41 = vpop.eup %1876 }
 0x148   : > { %v1879_v42 = vpop.eup %1878  ;;  %v681_v43 = vadd.f32 1.0, %v1877_v41 }
 0x149   : > { %v682_v44 = vadd.f32 1.0, %v1879_v42  ;;  %v999_v42 = vld [vmem:[#allocation2 + $0x520] sm:$0xff] }
 0x14a   : > { %1880 = vrcp.f32 %v681_v43  ;;  %v1001_v43 = vld [vmem:[#allocation2 + $0x530] sm:$0xff] }
 0x14b   : > { %1882 = vrcp.f32 %v682_v44  ;;  %v1004_v44 = vld [vmem:[#allocation2 + $0x548] sm:$0xff]  ;;  %v1787_v46 = vpack.c.bf16 %v1001_v43, %v999_v42 }
 0x154   : > { %v1881_v47 = vpop.eup %1880 }
 0x155   : > { %v1883_v50 = vpop.eup %1882  ;;  %v2274_v51 = vmul.f32 %v1881_v47, %v673_v35  ;;  %v995_v35 = vld [vmem:[#allocation2 + $0x500] sm:$0xff]  ;;  %v1789_v47 = vpack.c.bf16 %v1006_v45, %v1004_v44 }
 0x156   : > { %v688_v52 = vmul.f32 %v1883_v50, %v674_v37  ;;  %v1000_v37 = vld [vmem:[#allocation2 + $0x528] sm:$0xff]  ;;  %v1783_v40 = vpack.c.bf16 %v997_v36, %v995_v35  ;;  %v1129_v35 = vrot.slane %v1120_v38, %v669_v31 }
 0x157   : > { %689 = vst [vmem:[%s435_s19] sm:$0xff] %v2274_v51  ;;  %v1785_v41 = vpack.c.bf16 %v1002_v39, %v1000_v37  ;;  %v1008_v50 = vld [vmem:[#allocation2 + $0x568] sm:$0xff] }
 0x158   : > { %690 = vst [vmem:[%s435_s19 + $0x8] sm:$0xff] %v688_v52  ;;  %819 = vmatprep.mubr.f32.mxu1 %v688_v52  ;;  %955 = vmatprep.mubr.f32.mxu0 %v688_v52 }
 0x159   : > { %820 = vmatmul.mubr.f32.vlgmr.msra.gmra.mrb[0].mxu1 %v2274_v51  ;;  %956 = vmatmul.mubr.f32.vlgmr.msra.gmra.mrb[2].mxu0 %v2274_v51 }
 0x15a   : > { %1752 = vmatpush1.bf16.msra.mxu1 %v1751_v53  ;;  %1091 = vmatprep.mubr.f32.mxu1 %v688_v52  ;;  %v1010_v52 = vld [vmem:[#allocation2 + $0x578] sm:$0xff]  ;;  %v1791_v53 = vpack.c.bf16 %v1005_v49, %v1003_v48 }
 0x15b   : > { %1754 = vmatprep.subr.bf16.mxu1 %v1753_v54  ;;  %v1793_v54 = vpack.c.bf16 %v1010_v52, %v1008_v50 }
 0x15e   : > { %1756 = vmatpush1.bf16.msra.mxu1 %v1755_v59  ;;  %v1795_v59 = vpack.c.bf16 %v1009_v56, %v1007_v55 }
 0x15f   : > { %1758 = vmatprep.subr.bf16.mxu1 %v1757_v60  ;;  %v1797_v60 = vpack.c.bf16 %v1014_v58, %v1012_v57 }
 0x162   : > { %1760 = vmatpush1.bf16.msra.mxu1 %v1759_v2  ;;  %v1799_v2 = vpack.c.bf16 %v1013_v62, %v1011_v61 }
 0x163   : > { %1762 = vmatprep.subr.bf16.mxu1 %v1761_v3  ;;  %v1801_v3 = vpack.c.bf16 %v1018_v1, %v1016_v63  ;;  %v1518_v1 = vld [vmem:[%s2434_s6] ss:$0 sm:$0xff] }
 0x166   : > { %1764 = vmatpush1.bf16.msra.mxu1 %v1763_v8  ;;  %v1803_v8 = vpack.c.bf16 %v1017_v5, %v1015_v4 }
 0x167   : > { %1766 = vmatprep.subr.bf16.mxu1 %v1765_v9  ;;  %v1805_v9 = vpack.c.bf16 %v1022_v7, %v1020_v6 }
 0x16a   : > { %1768 = vmatpush1.bf16.msra.mxu1 %v1767_v14  ;;  %v1807_v14 = vpack.c.bf16 %v1021_v11, %v1019_v10 }
 0x16b   : > { %1770 = vmatprep.subr.bf16.mxu1 %v1769_v15  ;;  %v1809_v15 = vpack.c.bf16 %v1026_v13, %v1024_v12 }
 0x16e   : > { %1772 = vmatpush1.bf16.msra.mxu1 %v1771_v20 }
 0x16f   : > { %1774 = vmatprep.subr.bf16.mxu1 %v1773_v21 }
 0x172   : > { %1776 = vmatpush1.bf16.msra.mxu1 %v1775_v26 }
 0x173   : > { %1778 = vmatprep.subr.bf16.mxu1 %v1777_v27 }
 0x176   : > { %1780 = vmatpush1.bf16.msra.mxu1 %v1779_v33 }
 0x177   : > { %1782 = vmatprep.subr.bf16.mxu1 %v1781_v34 }
 0x17a   : > { %1784 = vmatpush1.bf16.msra.mxu1 %v1783_v40 }
 0x17b   : > { %1786 = vmatprep.subr.bf16.mxu1 %v1785_v41 }
 0x17e   : > { %1788 = vmatpush1.bf16.msra.mxu1 %v1787_v46 }
 0x17f   : > { %1790 = vmatprep.subr.bf16.mxu1 %v1789_v47 }
 0x182   : > { %1792 = vmatpush1.bf16.msra.mxu1 %v1791_v53 }
 0x183   : > { %1794 = vmatprep.subr.bf16.mxu1 %v1793_v54 }
 0x186   : > { %1796 = vmatpush1.bf16.msra.mxu1 %v1795_v59 }
 0x187   : > { %1798 = vmatprep.subr.bf16.mxu1 %v1797_v60 }
 0x18a   : > { %1800 = vmatpush1.bf16.msra.mxu1 %v1799_v2 }
 0x18b   : > { %1802 = vmatprep.subr.bf16.mxu1 %v1801_v3 }
 0x18e   : > { %1804 = vmatpush1.bf16.msra.mxu1 %v1803_v8 }
 0x18f   : > { %1806 = vmatprep.subr.bf16.mxu1 %v1805_v9 }
 0x192   : > { %1808 = vmatpush1.bf16.msra.mxu1 %v1807_v14 }
 0x193   : > { %1810 = vmatprep.subr.bf16.mxu1 %v1809_v15 }
 0x196   : > { %1812 = vmatpush1.bf16.msra.mxu1 %v1811_v18 }
 0x199   : > { %1092 = vmatmul.mubr.f32.vlgmr.msra.gmra.mrb[2].mxu1 %v2274_v51  ;;  %v1125_v51 = vrot.slane %v1120_v38, %v2260_v30  ;;  %v1276_v38 = vld [vmem:[%s2437_s9 + $0x80] sm:$0xff] }
 0x22c   : > { %v821_v19 = vpop.f32.mrb[0].mxu1  ;;  %v957_v20 = vpop.f32.mrb[2].mxu0 }
 0x22d   : > { %v1100_v21 = vrot.slane %v821_v19, 7  ;;  %v823_v22 = vpop.f32.mrb[1].mxu1  ;;  %v959_v23 = vpop.f32.mrb[3].mxu0 }
 0x22e   : > { %v1101_v24 = vrot.slane %v823_v22, 7 }
 0x22f   : > { %v1105_v25 = vsel %vm1104_vm4, 0.0, %v1100_v21 }
 0x230   : > { %v1107_v26 = vadd.f32 %v1105_v25, %v957_v20  ;;  %v1106_v27 = vsel %vm1104_vm4, 0.0, %v1101_v24  ;;  %v1948_v20 = vmov 0  }
 0x231   : > { %v1108_v28 = vadd.f32 %v1106_v27, %v959_v23  ;;  %1874 = vset.pattern.permute.xlu1 %v1948_v20  ;;  %1875 = vset.pattern.permute.xlu0 %v1948_v20  ;;  %v1289_v20 = vld [vmem:[%s2437_s9 + $0xe8] sm:$0xff] }
 0x26c   : > { %v1093_v0 = vpop.f32.mrb[2].mxu1 }
 0x26d   : > { %v1111_v32 = vrot.slane %v1093_v0, 1  ;;  %v1095_v33 = vpop.f32.mrb[3].mxu1  ;;  %v1277_v0 = vld [vmem:[%s2437_s9 + $0x88] sm:$0xff] }
 0x26e   : > { %v1112_v34 = vrot.slane %v1095_v33, 1  ;;  %v1813_v33 = vpack.c.bf16 %v1277_v0, %v1276_v38  ;;  %v1275_v38 = vld [vmem:[%s2437_s9 + $0x78] sm:$0xff] }
 0x26f   : > { %v1116_v36 = vsel %vm1115_vm5, %v1111_v32, 0.0  ;;  %v1260_v32 = vld [vmem:[%s2437_s9] sm:$0xff] }
 0x270   : > { %v1118_v37 = vadd.f32 %v1116_v36, %v1107_v26  ;;  %v1117_v39 = vsel %vm1115_vm5, %v1112_v34, 0.0  ;;  %v1278_v34 = vld [vmem:[%s2437_s9 + $0x90] sm:$0xff]  ;;  %1814 = vmatprep.subr.bf16.mxu0 %v1813_v33 }
 0x271   : > { %v1119_v40 = vadd.f32 %v1117_v39, %v1108_v28  ;;  %v1262_v39 = vld [vmem:[%s2437_s9 + $0x10] sm:$0xff] }
 0x272   : > { %v1132_v41 = vadd.f32 %v1125_v51, %v1118_v37  ;;  %v1261_v51 = vld [vmem:[%s2437_s9 + $0x8] sm:$0xff] }
 0x273   : > { %v1133_v42 = vadd.f32 %v1129_v35, %v1119_v40  ;;  %v1279_v35 = vld [vmem:[%s2437_s9 + $0x98] sm:$0xff]  ;;  %v1815_v36 = vpack.c.bf16 %v1261_v51, %v1260_v32 }
 0x274   : > { %v1516_v43 = vmul.f32 -1.442695, %v1132_v41  ;;  %v1817_v37 = vpack.c.bf16 %v1279_v35, %v1278_v34  ;;  %v1263_v40 = vld [vmem:[%s2437_s9 + $0x18] sm:$0xff] }
 0x275   : > { %v1517_v44 = vmul.f32 -1.442695, %v1133_v42  ;;  %1816 = vmatpush3.bf16.msra.mxu0 %v1815_v36 }
 0x276   : > { %1884 = vpow2.f32 %v1516_v43  ;;  %v1819_v43 = vpack.c.bf16 %v1263_v40, %v1262_v39  ;;  %1818 = vmatprep.subr.bf16.mxu0 %v1817_v37 }
 0x277   : > { %1886 = vpow2.f32 %v1517_v44 }
 0x279   : > { %1820 = vmatpush3.bf16.msra.mxu0 %v1819_v43  ;;  %v1521_v43 = vld [vmem:[%s2438_s10] ss:$0 sm:$0xff] }
 0x280   : > { %v1885_v45 = vpop.eup %1884 }
 0x281   : > { %v1887_v46 = vpop.eup %1886  ;;  %v1140_v47 = vadd.f32 1.0, %v1885_v45  ;;  %v1264_v45 = vld [vmem:[%s2437_s9 + $0x20] sm:$0xff] }
 0x282   : > { %v1141_v48 = vadd.f32 1.0, %v1887_v46  ;;  %v1265_v46 = vld [vmem:[%s2437_s9 + $0x28] sm:$0xff] }
 0x283   : > { %1888 = vrcp.f32 %v1140_v47  ;;  %v1282_v47 = vld [vmem:[%s2437_s9 + $0xb0] sm:$0xff] }
 0x284   : > { %1890 = vrcp.f32 %v1141_v48  ;;  %v1283_v48 = vld [vmem:[%s2437_s9 + $0xb8] sm:$0xff] }
 0x28d   : > { %v1889_v49 = vpop.eup %1888 }
 0x28e   : > { %v1891_v50 = vpop.eup %1890  ;;  %v2286_v29 = vmul.f32 %v1889_v49, %v1132_v41  ;;  %v1280_v41 = vld [vmem:[%s2437_s9 + $0xa0] sm:$0xff]  ;;  %v1823_v49 = vpack.c.bf16 %v1265_v46, %v1264_v45 }
 0x28f   : > { %v2288_v31 = vmul.f32 %v1891_v50, %v1133_v42  ;;  %v1281_v42 = vld [vmem:[%s2437_s9 + $0xa8] sm:$0xff]  ;;  %v1825_v50 = vpack.c.bf16 %v1283_v48, %v1282_v47 }
 0x290   : > { %v1148_v52 = vrot.slane %v2286_v29, 4  ;;  %v1821_v44 = vpack.c.bf16 %v1281_v42, %v1280_v41 }
 0x291   : > { %v1154_v53 = vrot.slane %v2288_v31, 4 }
 0x292   : > { %v1149_v54 = vadd.f32 %v1148_v52, %v2286_v29  ;;  %1822 = vmatprep.subr.bf16.mxu0 %v1821_v44  ;;  %v1266_v52 = vld [vmem:[%s2437_s9 + $0x30] sm:$0xff] }
 0x293   : > { %v1155_v55 = vadd.f32 %v1154_v53, %v2288_v31  ;;  %v1267_v53 = vld [vmem:[%s2437_s9 + $0x38] sm:$0xff]  ;;  %1824 = vmatpush3.bf16.msra.mxu0 %v1823_v49 }
 0x294   : > { %v1150_v56 = vrot.slane %v1149_v54, 2  ;;  %1826 = vmatprep.subr.bf16.mxu0 %v1825_v50 }
 0x295   : > { %v1156_v57 = vrot.slane %v1155_v55, 2 }
 0x296   : > { %v1151_v58 = vadd.f32 %v1150_v56, %v1149_v54  ;;  %v1284_v54 = vld [vmem:[%s2437_s9 + $0xc0] sm:$0xff]  ;;  %v1827_v56 = vpack.c.bf16 %v1267_v53, %v1266_v52 }
 0x297   : > { %v1157_v59 = vadd.f32 %v1156_v57, %v1155_v55  ;;  %v1285_v55 = vld [vmem:[%s2437_s9 + $0xc8] sm:$0xff] }
 0x298   : > { %v1152_v60 = vrot.slane %v1151_v58, 1  ;;  %v1829_v57 = vpack.c.bf16 %v1285_v55, %v1284_v54  ;;  %1828 = vmatpush3.bf16.msra.mxu0 %v1827_v56 }
 0x299   : > { %v1158_v62 = vrot.slane %v1157_v59, 1 }
 0x29a   : > { %v1153_v61 = vadd.f32 %v1152_v60, %v1151_v58  ;;  %v1268_v58 = vld [vmem:[%s2437_s9 + $0x40] sm:$0xff]  ;;  %1830 = vmatprep.subr.bf16.mxu0 %v1829_v57 }
 0x29b   : > { %v1159_v63 = vadd.f32 %v1158_v62, %v1157_v59  ;;  %v1269_v59 = vld [vmem:[%s2437_s9 + $0x48] sm:$0xff] }
 0x29c   : > { %1170 = vrot.lane.b32.xlu1 %v1153_v61, %s1945_s23  ;;  %1162 = vrot.lane.b32.xlu0 %v1153_v61, %s1946_s27  ;;  %v1831_v60 = vpack.c.bf16 %v1269_v59, %v1268_v58 }
 0x29e   : > { %1832 = vmatpush3.bf16.msra.mxu0 %v1831_v60 }
 0x2a0   : > { %1166 = vrot.lane.b32.xlu0 %v1153_v61, %s1947_s26  ;;  %1176 = vrot.lane.b32.xlu1 %v1159_v63, %s1946_s27 }
 0x2a4   : > { %1180 = vrot.lane.b32.xlu0 %v1159_v63, %s1947_s26  ;;  %1184 = vrot.lane.b32.xlu1 %v1159_v63, %s1945_s23 }
 0x2a8   : > { %1206 = vbcast.lane.b32.xlu1 %v1518_v1, 256 }
 0x30e   : > { %v1163_v2 = vpop.permute.xlu0 %1162  ;;  %v1171_v3 = vpop.permute.xlu1 %1170 }
 0x30f   : > { %v1165_v4 = vadd.f32 %v1163_v2, %v1153_v61  ;;  %v1217_v61 = vld [vmem:[%s2435_s7] sm:$0xff] }
 0x312   : > { %v1167_v5 = vpop.permute.xlu0 %1166  ;;  %v1177_v8 = vpop.permute.xlu1 %1176 }
 0x313   : > { %v1169_v6 = vadd.f32 %v1167_v5, %v1165_v4 }
 0x315   : > { %v1173_v7 = vadd.f32 %v1171_v3, %v1169_v6 }
 0x316   : > { %v1181_v11 = vpop.permute.xlu0 %1180  ;;  %v1185_v13 = vpop.permute.xlu1 %1184 }
 0x317   : > { %v1174_v9 = vadd.f32 %v1173_v7, %v1159_v63  ;;  %v1231_v7 = vld [vmem:[%s2436_s8] sm:$0x1] }
 0x319   : > { %v1179_v10 = vadd.f32 %v1177_v8, %v1174_v9 }
 0x31a   : > { %v1207_v21 = vpop.permute.xlu1 %1206 }
 0x31b   : > { %v1183_v12 = vadd.f32 %v1181_v11, %v1179_v10 }
 0x31d   : > { %v1187_v14 = vadd.f32 %v1185_v13, %v1183_v12  ;;  %v1286_v12 = vld [vmem:[%s2437_s9 + $0xd0] sm:$0xff]  ;;  %v1287_v13 = vld [vmem:[%s2437_s9 + $0xd8] sm:$0xff] }
 0x31f   : > { %v1188_v15 = vmul.f32 0.015625, %v1187_v14 }
 0x321   : > { %v1193_v17 = vrot.slane %v1188_v15, %v2260_v30  ;;  %v1833_v15 = vpack.c.bf16 %v1287_v13, %v1286_v12 }
 0x323   : > { %v1194_v18 = vmul.f32 %v1193_v17, %v1189_v16  ;;  %v1270_v16 = vld [vmem:[%s2437_s9 + $0x50] sm:$0xff]  ;;  %v1271_v17 = vld [vmem:[%s2437_s9 + $0x58] sm:$0xff]  ;;  %1834 = vmatprep.subr.bf16.mxu0 %v1833_v15 }
 0x325   : > { %v1196_v19 = vsel %vm1195_vm6, %v1194_v18, 0.0  ;;  %v1835_v18 = vpack.c.bf16 %v1271_v17, %v1270_v16 }
 0x326   : > { %1197 = vadd.xlane.f32.xlu0 %v1196_v19  ;;  %v1288_v19 = vld [vmem:[%s2437_s9 + $0xe0] sm:$0xff] }
 0x327   : > { %1836 = vmatpush3.bf16.msra.mxu0 %v1835_v18 }
 0x3b3   : > { %v1198_v22 = vpop.xlane.xlu0 %1197 }
 0x3b4   : > { %v1209_v23 = vadd.f32 %v1207_v21, %v1198_v22  ;;  %v1837_v21 = vpack.c.bf16 %v1289_v20, %v1288_v19  ;;  %v1272_v22 = vld [vmem:[%s2437_s9 + $0x60] sm:$0xff] }
 0x3b6   : > { %v1519_v24 = vmul.f32 -1.442695, %v1209_v23  ;;  %1838 = vmatprep.subr.bf16.mxu0 %v1837_v21 }
 0x3b8   : > { %1892 = vpow2.f32 %v1519_v24 }
 0x3c2   : > { %v1893_v25 = vpop.eup %1892 }
 0x3c3   : > { %v1213_v26 = vadd.f32 1.0, %v1893_v25  ;;  %v1290_v25 = vld [vmem:[%s2437_s9 + $0xf0] sm:$0xff] }
 0x3c5   : > { %1894 = vrcp.f32 %v1213_v26  ;;  %v1291_v26 = vld [vmem:[%s2437_s9 + $0xf8] sm:$0xff] }
 0x3cf   : > { %v1895_v27 = vpop.eup %1894 }
 0x3d0   : > { %v1216_v28 = vmul.f32 %v1895_v27, %v1209_v23  ;;  %v1273_v23 = vld [vmem:[%s2437_s9 + $0x68] sm:$0xff]  ;;  %v1841_v27 = vpack.c.bf16 %v1291_v26, %v1290_v25 }
 0x3d1   : > { %v1839_v24 = vpack.c.bf16 %v1273_v23, %v1272_v22 }
 0x3d2   : > { %1220 = vperm.xlu1 %1874, %v1216_v28   ;;  %v1274_v28 = vld [vmem:[%s2437_s9 + $0x70] sm:$0xff] }
 0x3d3   : > { %1840 = vmatpush3.bf16.msra.mxu0 %v1839_v24  ;;  %v1843_v0 = vpack.c.bf16 %v1275_v38, %v1274_v28 }
 0x3d4   : > { %1842 = vmatprep.subr.bf16.mxu0 %v1841_v27 }
 0x3d7   : > { %1844 = vmatpush3.bf16.msra.mxu0 %v1843_v0 }
 0x451   : > { %v1221_v62 = vpop.permute.xlu1 %1220 }
 0x452   : > { %v1223_v63 = vmul.f32 %v1221_v62, %v1217_v61 }
 0x454   : > { %v1224_v1 = vsel %vm1195_vm6, %v1223_v63, 0.0 }
 0x455   : > { %v1225_v2 = vrot.slane %v1224_v1, 4 }
 0x457   : > { %v1226_v3 = vadd.f32 %v1225_v2, %v1224_v1 }
 0x459   : > { %v1227_v4 = vrot.slane %v1226_v3, 2 }
 0x45b   : > { %v1228_v5 = vadd.f32 %v1227_v4, %v1226_v3 }
 0x45d   : > { %v1229_v6 = vrot.slane %v1228_v5, 1 }
 0x45f   : > { %v1230_v8 = vadd.f32 %v1229_v6, %v1228_v5 }
 0x461   : > { %v1232_v9 = vadd.f32 %v1231_v7, %v1230_v8 }
 0x463   : > { %v1520_v10 = vmul.f32 -1.442695, %v1232_v9 }
 0x465   : > { %1896 = vpow2.f32 %v1520_v10 }
 0x46f   : > { %v1897_v11 = vpop.eup %1896 }
 0x470   : > { %v1236_v14 = vadd.f32 1.0, %v1897_v11 }
 0x472   : > { %1898 = vrcp.f32 %v1236_v14 }
 0x47c   : > { %v1899_v32 = vpop.eup %1898 }
 0x47d   : > { %1240 = vrot.lane.b32.xlu1 %v1899_v32, %s1945_s23  ;;  %s1479_s23 = sshll.u32 %s2451_s22, 3 }
 0x47e   : > { %s439_s18 = scalar_lea.vmem %s2440_s12, %s1479_s23 }
 0x481   : > { %1243 = vrot.lane.b32.xlu1 %v1899_v32, %s1947_s26 }
 0x485   : > { %1246 = vrot.lane.b32.xlu1 %v1899_v32, %s1946_s27 }
 0x4ef   : > { %v1241_v33 = vpop.permute.xlu1 %1240 }
 0x4f0   : > { %v1249_v34 = vsel %vm1195_vm6, %v1899_v32, %v1241_v33 }
 0x4f3   : > { %v1244_v51 = vpop.permute.xlu1 %1243 }
 0x4f4   : > { %v1251_v35 = vsel %vm1250_vm7, %v1249_v34, %v1244_v51 }
 0x4f7   : > { %v1247_v36 = vpop.permute.xlu1 %1246 }
 0x4f8   : > { %v1253_v37 = vsel %vm1252_vm8, %v1251_v35, %v1247_v36 }
 0x4f9   : > { %v1257_v39 = vrot.slane %v1253_v37, %v2260_v30 }
 0x4fb   : > { %v1258_v40 = vmul.f32 %v1257_v39, %v2286_v29  ;;  %v1259_v41 = vmul.f32 %v1257_v39, %v2288_v31 }
 0x4fd   : > { %1363 = vmatprep.mubr.f32.mxu0 %v1259_v41 }
 0x4fe   : > { %1364 = vmatmul.mubr.f32.vlgmr.msra.gmra.mrb[4].mxu0 %v1258_v40 }
 0x5d1   : > { %v1558_v42 = vpop.f32.mrb[4].mxu0 }
 0x5d2   : > { %v1559_v44 = vpop.f32.mrb[5].mxu0 }
 0x5d3   : > { %v1560_v45 = vadd.f32 %v1559_v44, %v1558_v42 }
 0x5d5   : > { %v1366_v46 = vadd.f32 %v1560_v45, %v1521_v43 }
 0x5d7   : > { %1369 = vst [vmem:[%s439_s18] sm:$0xff] %v1366_v46 }
 0x5d8 PF: > { %s24_s21 = sadd.s32 1, %s1938_s21  }
 0x5d9   : > { %p21_p3 = scmp.ge.s32.totalorder %s24_s21, 4  }
 0x5db   :  { %23 = sbr.rel (!%p21_p3) target bundleno = 1 (0x1), region = 114 }
 0x5e2   :  { %1405 = vsyncpa [#allocation3], 1 }
 0x5e3   :  { %1407 = vsyncpa [#allocation3 + $0x1], 1 }

</bundles_post_ra>
